<compile_context>
chip_gen: v5e
topology: v5e:2x2
jax: 0.10.0
libtpu: 0.0.40
codegen_flags: <defaults>
</compile_context>

<pallas_src>
import functools

import jax
import jax.numpy as jnp
from jax import lax
from jax.experimental import pallas as pl
from jax.experimental.pallas import tpu as pltpu

EPS = 1e-5  # PyTorch GroupNorm default eps


def _round_up(x, m):
    return ((x + m - 1) // m) * m


def _group_avg_matrix(c, num_groups, hw, c_pad=None):
    """(c_pad, c_pad) matrix; [c', c] = 1/(hw*cg) when c', c share a group, else 0.

    `sums @ m` therefore yields per-group means broadcast back to every (real)
    channel; padded channels get zero rows/cols so their mean/var stay 0.
    """
    cg = c // num_groups
    gid = jnp.arange(c) // cg
    m = (gid[:, None] == gid[None, :]).astype(jnp.float32) / float(hw * cg)
    if c_pad is not None and c_pad > c:
        m = jnp.pad(m, ((0, c_pad - c), (0, c_pad - c)))
    return m


def _groupnorm_silu(y, group_avg, gamma, beta, pad_ratio):
    """Centered GroupNorm (PyTorch semantics) + SiLU on an (HWp, C) fp32 tile.

    Requires y == 0 at padded spatial positions; pad_ratio = (#pad)/(#real)
    exactly corrects the centered second moment for those zeros.
    """
    s1 = jnp.sum(y, axis=0, keepdims=True)                                  # (1, C)
    mean = jnp.dot(s1, group_avg, preferred_element_type=jnp.float32)       # group mean
    yc = y - mean                                                           # pads become -mean
    s2 = jnp.sum(yc * yc, axis=0, keepdims=True)
    ex2 = jnp.dot(s2, group_avg, preferred_element_type=jnp.float32)
    var = jnp.maximum(ex2 - mean * mean * pad_ratio, 0.0)                   # exact pad correction
    z = yc * lax.rsqrt(var + EPS) * gamma + beta
    return z * jax.nn.sigmoid(z)                                            # SiLU


def bottleneck_kernel(x_ref, w1_ref, m1_ref, g1_ref, b1_ref,
                      w2_ref, m2_ref, g2_ref, b2_ref,
                      o_ref, a1p_ref, y2acc_ref,
                      *, W, Wp, PAD, HWp, pad_ratio, add_shortcut):
    CH = w2_ref.shape[1]

    x = x_ref[0].astype(jnp.float32)                         # (HWp, C1x), zero at pad col/chan

    # ---- cv1: 1x1 conv == channel matmul (bf16 in, fp32 acc) -> GroupNorm -> SiLU
    y1 = jnp.dot(x.astype(jnp.bfloat16), w1_ref[...],
                 preferred_element_type=jnp.float32)         # (HWp, CH); zero at pad column
    a1 = _groupnorm_silu(y1, m1_ref[...], g1_ref[...], b1_ref[...], pad_ratio)

    # Re-zero the spatial pad column (the GN shift + SiLU made it nonzero); the
    # select stays in f32 (no bf16 VALU on v5e), then cast once and store into the
    # halo-padded bf16 scratch.
    col = lax.broadcasted_iota(jnp.int32, (HWp, 1), 0) % Wp
    col_valid = col < W
    a1 = jnp.where(col_valid, a1, 0.0)

    # Halo rows are re-zeroed every step: they are tiny (2*PAD rows of CH bf16),
    # and gating on program_id(0) == 0 is unsafe once the parallel N axis is split
    # across TensorCores (the other core would never initialize its scratch).
    a1p_ref[0:PAD, :] = jnp.zeros((PAD, CH), a1p_ref.dtype)
    a1p_ref[PAD + HWp:PAD + HWp + PAD, :] = jnp.zeros((PAD, CH), a1p_ref.dtype)
    a1p_ref[PAD:PAD + HWp, :] = a1.astype(a1p_ref.dtype)

    # ---- cv2: 3x3 "same" conv as 9 shifted (HWp, CH) x (CH, C2p) matmuls, fp32
    # accumulated in VMEM.  The extra zero column per row plus the zero halo rows
    # make every tap a pure offset load: no per-tap mask, no concat slab, and the
    # accumulate chain maps onto the v7x MRB in-place-accumulate path.
    for ky in range(3):
        for kx in range(3):
            t = ky * 3 + kx
            d = (ky - 1) * Wp + (kx - 1)
            patch = a1p_ref[PAD + d:PAD + d + HWp, :]        # bf16, no cast / no mask
            contrib = jnp.dot(patch, w2_ref[t],
                              preferred_element_type=jnp.float32)
            if t == 0:
                y2acc_ref[...] = contrib
            else:
                y2acc_ref[...] += contrib

    # Pad-column conv outputs are garbage (their window touches real pixels):
    # zero them so GroupNorm-2 statistics only see the real HW positions.
    y2 = jnp.where(col_valid, y2acc_ref[...], 0.0)
    a2 = _groupnorm_silu(y2, m2_ref[...], g2_ref[...], b2_ref[...], pad_ratio)

    if add_shortcut:
        a2 = a2 + x

    # Lane-dense store: C2p >= 128, so this is an unmasked vst.
    o_ref[0] = a2.astype(o_ref.dtype)


def _pick_vmem_limit(est_bytes):
    try:
        cap = int(pltpu.get_tpu_info().vmem_capacity_bytes)
    except Exception:  # pragma: no cover - conservative fallback
        cap = 128 * 1024 * 1024
    want = int(1.5 * est_bytes) + (8 << 20)
    return int(max(32 << 20, min(want, int(0.8 * cap))))


def bottleneck_forward(x, w1, g1, b1, w2, g2, b2, *, shortcut=True, out_dtype=None):
    """x: (N, H, W, C1) NHWC.  w1: (C1, CH) 1x1 conv.  w2: (3, 3, CH, C2) HWIO."""
    N, H, W, C1 = x.shape
    CH = w1.shape[1]
    C2 = w2.shape[3]
    assert w1.shape[0] == C1, (w1.shape, C1)
    assert w2.shape[:3] == (3, 3, CH), w2.shape
    assert CH % 8 == 0 and C2 % 8 == 0, "GroupNorm(C // 8, C) needs C % 8 == 0"

    add = shortcut and (C1 == C2)
    out_dtype = x.dtype if out_dtype is None else jnp.dtype(out_dtype)

    # Spatial plumbing (wrapper side, free): one extra zero column per image row
    # turns the 3x3 "same" conv into pure flat-offset taps inside the kernel.
    Wp = W + 1
    HW = H * W
    HWp = H * Wp
    PAD = _round_up(Wp + 1, 16)                 # zero halo rows; 16 keeps bf16 tiles aligned
    pad_ratio = float(HWp - HW) / float(HW)

    # Lane-dense output: pad C2 (and, when the residual is added, C1/x/w1-in) to
    # >= 128 so the final store is an unmasked vst instead of masked vst.msk.
    C2p = 128 if C2 < 128 else C2
    C1x = C2p if add else C1

    # Wrapper-side layout/weight prep (free): pad + flatten spatial dims, cast
    # conv weights to bf16, split the 3x3 taps into a leading dim, precompute the
    # GroupNorm group-averaging matrices.
    x_p = jnp.pad(x, ((0, 0), (0, 0), (0, Wp - W), (0, C1x - C1)))
    x_flat = x_p.reshape(N, HWp, C1x)
    w1_p = jnp.pad(jnp.asarray(w1, jnp.bfloat16), ((0, C1x - C1), (0, 0)))          # (C1x, CH)
    w2_p = jnp.pad(jnp.asarray(w2, jnp.bfloat16),
                   ((0, 0), (0, 0), (0, 0), (0, C2p - C2))).reshape(9, CH, C2p)     # (9, CH, C2p)
    g1_ = jnp.asarray(g1, jnp.float32).reshape(1, CH)
    b1_ = jnp.asarray(b1, jnp.float32).reshape(1, CH)
    g2_ = jnp.pad(jnp.asarray(g2, jnp.float32).reshape(1, C2), ((0, 0), (0, C2p - C2)))
    b2_ = jnp.pad(jnp.asarray(b2, jnp.float32).reshape(1, C2), ((0, 0), (0, C2p - C2)))
    m1 = _group_avg_matrix(CH, CH // 8, HW)
    m2 = _group_avg_matrix(C2, C2 // 8, HW, c_pad=C2p)

    # Shape-derived VMEM budget, clamped to the current generation's capacity.
    est = (2 * HWp * C1x * x.dtype.itemsize                      # x block (double-buffered)
           + 2 * HWp * C2p * out_dtype.itemsize                  # out block
           + 2 * (C1x * CH + 9 * CH * C2p) * 2                   # bf16 weights
           + 2 * (CH * CH + C2p * C2p + 2 * CH + 2 * C2p) * 4    # GN matrices / affine
           + (HWp + 2 * PAD) * CH * 2                            # a1 scratch (bf16)
           + HWp * C2p * 4                                       # cv2 fp32 accumulator
           + 6 * HWp * max(CH, C2p) * 4)                         # headroom for y1/a1/yc/z temps
    vmem_limit = _pick_vmem_limit(est)

    kernel = functools.partial(bottleneck_kernel, W=W, Wp=Wp, PAD=PAD, HWp=HWp,
                               pad_ratio=pad_ratio, add_shortcut=add)

    # TODO(synk): add a second "parallel" grid axis (H strips with a 1-row halo,
    # two-pass GroupNorm) so small-N workloads can feed both v7x TensorCores.
    out = pl.pallas_call(
        kernel,
        out_shape=jax.ShapeDtypeStruct((N, HWp, C2p), out_dtype),
        grid_spec=pltpu.PrefetchScalarGridSpec(
            num_scalar_prefetch=0,
            grid=(N,),
            in_specs=[
                pl.BlockSpec((1, HWp, C1x), lambda n: (n, 0, 0)),   # x (padded, flattened)
                pl.BlockSpec((C1x, CH), lambda n: (0, 0)),          # w1
                pl.BlockSpec((CH, CH), lambda n: (0, 0)),           # GN1 group-avg matrix
                pl.BlockSpec((1, CH), lambda n: (0, 0)),            # gamma1
                pl.BlockSpec((1, CH), lambda n: (0, 0)),            # beta1
                pl.BlockSpec((9, CH, C2p), lambda n: (0, 0, 0)),    # w2 (tap-major)
                pl.BlockSpec((C2p, C2p), lambda n: (0, 0)),         # GN2 group-avg matrix
                pl.BlockSpec((1, C2p), lambda n: (0, 0)),           # gamma2
                pl.BlockSpec((1, C2p), lambda n: (0, 0)),           # beta2
            ],
            out_specs=pl.BlockSpec((1, HWp, C2p), lambda n: (n, 0, 0)),
            scratch_shapes=[
                pltpu.VMEM((HWp + 2 * PAD, CH), jnp.bfloat16),      # a1, halo-padded (bf16)
                pltpu.VMEM((HWp, C2p), jnp.float32),                # cv2 accumulator
            ],
        ),
        compiler_params=pltpu.CompilerParams(
            dimension_semantics=("parallel",),
            vmem_limit_bytes=vmem_limit,
        ),
    )(x_flat, w1_p, m1, g1_, b1_, w2_p, m2, g2_, b2_)

    return out.reshape(N, H, Wp, C2p)[:, :, :W, :C2]


# ---------------- pure-JAX reference (for correctness check) ----------------
def _ref_gn_silu(y, ng, gamma, beta):
    N, H, W, C = y.shape
    cg = C // ng
    yg = y.reshape(N, H, W, ng, cg)
    mean = yg.mean(axis=(1, 2, 4), keepdims=True)
    var = ((yg - mean) ** 2).mean(axis=(1, 2, 4), keepdims=True)
    z = ((yg - mean) / jnp.sqrt(var + EPS)).reshape(N, H, W, C)
    z = z * gamma.reshape(1, 1, 1, C) + beta.reshape(1, 1, 1, C)
    return z * jax.nn.sigmoid(z)


def bottleneck_ref(x, w1, g1, b1, w2, g2, b2, *, shortcut=True):
    CH = w1.shape[1]
    C2 = w2.shape[3]
    dn = ('NHWC', 'HWIO', 'NHWC')
    y1 = lax.conv_general_dilated(x, w1.reshape(1, 1, *w1.shape), (1, 1),
                                  'VALID', dimension_numbers=dn)
    a1 = _ref_gn_silu(y1, CH // 8, g1, b1)
    y2 = lax.conv_general_dilated(a1, w2, (1, 1), ((1, 1), (1, 1)),
                                  dimension_numbers=dn)
    a2 = _ref_gn_silu(y2, C2 // 8, g2, b2)
    add = shortcut and (x.shape[-1] == a2.shape[-1])
    return x + a2 if add else a2


def _check_case(key, N, H, W, c1, c2, shortcut):
    ch = int(c2 * 0.5)
    k1, k2, k3, k4, k5, k6, k7 = jax.random.split(key, 7)
    x = jax.random.normal(k1, (N, H, W, c1), jnp.float32)
    w1 = 0.2 * jax.random.normal(k2, (c1, ch), jnp.float32)
    w2 = 0.1 * jax.random.normal(k3, (3, 3, ch, c2), jnp.float32)
    g1 = 1.0 + 0.1 * jax.random.normal(k4, (1, ch), jnp.float32)
    b1 = 0.1 * jax.random.normal(k5, (1, ch), jnp.float32)
    g2 = 1.0 + 0.1 * jax.random.normal(k6, (1, c2), jnp.float32)
    b2 = 0.1 * jax.random.normal(k7, (1, c2), jnp.float32)

    out = bottleneck_forward(x, w1, g1, b1, w2, g2, b2, shortcut=shortcut)
    out = jax.block_until_ready(out)
    ref = bottleneck_ref(x, w1, g1, b1, w2, g2, b2, shortcut=shortcut)
    assert out.shape == (N, H, W, c2), out.shape
    max_err = float(jnp.max(jnp.abs(out - ref)))
    if not bool(jnp.allclose(out, ref, atol=5e-2, rtol=5e-2)):
        raise AssertionError(
            f"Pallas mismatch (c1={c1}, c2={c2}, shortcut={shortcut}), max_err={max_err}")


if __name__ == "__main__":
    key = jax.random.PRNGKey(0)
    k_a, k_b = jax.random.split(key)
    # Bottleneck(c1=16, c2=16, shortcut=True), e=0.5 -> ch=8 (residual path, padded output)
    _check_case(k_a, N=2, H=8, W=8, c1=16, c2=16, shortcut=True)
    # c1 != c2 -> residual disabled; also exercises the unpadded-input path.
    _check_case(k_b, N=2, H=8, W=8, c1=24, c2=16, shortcut=True)
    print("KERNEL_OK")
</pallas_src>

<mosaic_0001>
module attributes {stable_mosaic.version = 11 : i64} {
  func.func @bottleneck_kernel(%arg0: i32, %arg1: memref<1x72x128xf32, #tpu.memory_space<vmem>>, %arg2: memref<128x8xbf16, #tpu.memory_space<vmem>>, %arg3: memref<8x8xf32, #tpu.memory_space<vmem>>, %arg4: memref<1x8xf32, #tpu.memory_space<vmem>>, %arg5: memref<1x8xf32, #tpu.memory_space<vmem>>, %arg6: memref<9x8x128xbf16, #tpu.memory_space<vmem>>, %arg7: memref<128x128xf32, #tpu.memory_space<vmem>>, %arg8: memref<1x128xf32, #tpu.memory_space<vmem>>, %arg9: memref<1x128xf32, #tpu.memory_space<vmem>>, %arg10: memref<1x72x128xf32, #tpu.memory_space<vmem>>, %arg11: memref<104x8xbf16, #tpu.memory_space<vmem>>, %arg12: memref<72x128xf32, #tpu.memory_space<vmem>>) attributes {dimension_semantics = [#tpu.dimension_semantics<parallel>], iteration_bounds = array<i64: 2>, scalar_prefetch = 0 : i64, scratch_operands = 2 : i64, tpu.core_type = #tpu.core_type<tc>, window_params = [{transform_indices = @transform_0, window_bounds = array<i64: 1, 72, 128>}, {pipeline_mode = #tpu.pipeline_mode<synchronous>, transform_indices = @transform_1, window_bounds = array<i64: 128, 8>}, {pipeline_mode = #tpu.pipeline_mode<synchronous>, transform_indices = @transform_2, window_bounds = array<i64: 8, 8>}, {pipeline_mode = #tpu.pipeline_mode<synchronous>, transform_indices = @transform_3, window_bounds = array<i64: 1, 8>}, {pipeline_mode = #tpu.pipeline_mode<synchronous>, transform_indices = @transform_4, window_bounds = array<i64: 1, 8>}, {pipeline_mode = #tpu.pipeline_mode<synchronous>, transform_indices = @transform_5, window_bounds = array<i64: 9, 8, 128>}, {pipeline_mode = #tpu.pipeline_mode<synchronous>, transform_indices = @transform_6, window_bounds = array<i64: 128, 128>}, {pipeline_mode = #tpu.pipeline_mode<synchronous>, transform_indices = @transform_7, window_bounds = array<i64: 1, 128>}, {pipeline_mode = #tpu.pipeline_mode<synchronous>, transform_indices = @transform_8, window_bounds = array<i64: 1, 128>}, {transform_indices = @transform_9, window_bounds = array<i64: 1, 72, 128>}]} {
    %c0 = arith.constant 0 : index
    %c0_0 = arith.constant 0 : index
    %c0_1 = arith.constant 0 : index
    %0 = vector.load %arg1[%c0, %c0_0, %c0_1] : memref<1x72x128xf32, #tpu.memory_space<vmem>>, vector<1x72x128xf32>
    %1 = vector.shape_cast %0 : vector<1x72x128xf32> to vector<72x128xf32>
    %2 = arith.truncf %1 : vector<72x128xf32> to vector<72x128xbf16>
    %c0_2 = arith.constant 0 : index
    %c0_3 = arith.constant 0 : index
    %3 = vector.load %arg2[%c0_2, %c0_3] : memref<128x8xbf16, #tpu.memory_space<vmem>>, vector<128x8xbf16>
    %cst = arith.constant dense<0.000000e+00> : vector<72x8xf32>
    %4 = tpu.matmul %2, %3, %cst {dimension_numbers = #tpu.dot_dimension_numbers<[1], [0], [0], [1], [0, 0, 1, 1], [], []>} : vector<72x128xbf16>, vector<128x8xbf16>, vector<72x8xf32> -> vector<72x8xf32>
    %c0_4 = arith.constant 0 : index
    %c0_5 = arith.constant 0 : index
    %5 = vector.load %arg3[%c0_4, %c0_5] : memref<8x8xf32, #tpu.memory_space<vmem>>, vector<8x8xf32>
    %c0_6 = arith.constant 0 : index
    %c0_7 = arith.constant 0 : index
    %6 = vector.load %arg4[%c0_6, %c0_7] : memref<1x8xf32, #tpu.memory_space<vmem>>, vector<1x8xf32>
    %c0_8 = arith.constant 0 : index
    %c0_9 = arith.constant 0 : index
    %7 = vector.load %arg5[%c0_8, %c0_9] : memref<1x8xf32, #tpu.memory_space<vmem>>, vector<1x8xf32>
    %cst_10 = arith.constant dense<0.000000e+00> : vector<8xf32>
    %8 = vector.multi_reduction <add>, %4, %cst_10 [0] : vector<72x8xf32> to vector<8xf32>
    %9 = vector.shape_cast %8 : vector<8xf32> to vector<1x8xf32>
    %cst_11 = arith.constant dense<0.000000e+00> : vector<1x8xf32>
    %10 = tpu.matmul %9, %5, %cst_11 {dimension_numbers = #tpu.dot_dimension_numbers<[1], [0], [0], [1], [0, 0, 1, 1], [], []>} : vector<1x8xf32>, vector<8x8xf32>, vector<1x8xf32> -> vector<1x8xf32>
    %11 = vector.broadcast %10 : vector<1x8xf32> to vector<72x8xf32>
    %12 = arith.subf %4, %11 : vector<72x8xf32>
    %13 = arith.mulf %12, %12 : vector<72x8xf32>
    %cst_12 = arith.constant dense<0.000000e+00> : vector<8xf32>
    %14 = vector.multi_reduction <add>, %13, %cst_12 [0] : vector<72x8xf32> to vector<8xf32>
    %15 = vector.shape_cast %14 : vector<8xf32> to vector<1x8xf32>
    %cst_13 = arith.constant dense<0.000000e+00> : vector<1x8xf32>
    %16 = tpu.matmul %15, %5, %cst_13 {dimension_numbers = #tpu.dot_dimension_numbers<[1], [0], [0], [1], [0, 0, 1, 1], [], []>} : vector<1x8xf32>, vector<8x8xf32>, vector<1x8xf32> -> vector<1x8xf32>
    %17 = arith.mulf %10, %10 : vector<1x8xf32>
    %cst_14 = arith.constant 1.250000e-01 : f32
    %18 = vector.broadcast %cst_14 : f32 to vector<1x8xf32>
    %19 = arith.mulf %17, %18 : vector<1x8xf32>
    %20 = arith.subf %16, %19 : vector<1x8xf32>
    %cst_15 = arith.constant 0.000000e+00 : f32
    %21 = vector.broadcast %cst_15 : f32 to vector<1x8xf32>
    %22 = arith.maximumf %20, %21 : vector<1x8xf32>
    %cst_16 = arith.constant 9.99999974E-6 : f32
    %23 = vector.broadcast %cst_16 : f32 to vector<1x8xf32>
    %24 = arith.addf %22, %23 : vector<1x8xf32>
    %25 = math.rsqrt %24 : vector<1x8xf32>
    %26 = vector.broadcast %25 : vector<1x8xf32> to vector<72x8xf32>
    %27 = arith.mulf %12, %26 : vector<72x8xf32>
    %28 = vector.broadcast %6 : vector<1x8xf32> to vector<72x8xf32>
    %29 = arith.mulf %27, %28 : vector<72x8xf32>
    %30 = vector.broadcast %7 : vector<1x8xf32> to vector<72x8xf32>
    %31 = arith.addf %29, %30 : vector<72x8xf32>
    %32 = arith.negf %31 : vector<72x8xf32>
    %33 = math.exp %32 : vector<72x8xf32>
    %cst_17 = arith.constant 1.000000e+00 : f32
    %34 = vector.broadcast %cst_17 : f32 to vector<72x8xf32>
    %35 = arith.addf %34, %33 : vector<72x8xf32>
    %36 = arith.divf %34, %35 : vector<72x8xf32>
    %37 = arith.mulf %31, %36 : vector<72x8xf32>
    %38 = tpu.iota {dimensions = array<i32: 0>} : vector<72x1xi32>
    %c9_i32 = arith.constant 9 : i32
    %c0_i32 = arith.constant 0 : i32
    %39 = arith.cmpi eq, %c9_i32, %c0_i32 : i32
    %c1_i32 = arith.constant 1 : i32
    %40 = arith.select %39, %c1_i32, %c9_i32 : i32
    %41 = vector.broadcast %40 : i32 to vector<72x1xi32>
    %42 = arith.remsi %38, %41 : vector<72x1xi32>
    %c0_i32_18 = arith.constant 0 : i32
    %43 = vector.broadcast %c0_i32_18 : i32 to vector<72x1xi32>
    %44 = arith.cmpi ne, %42, %43 : vector<72x1xi32>
    %c0_i32_19 = arith.constant 0 : i32
    %45 = vector.broadcast %c0_i32_19 : i32 to vector<72x1xi32>
    %46 = arith.cmpi slt, %42, %45 : vector<72x1xi32>
    %c0_i32_20 = arith.constant 0 : i32
    %47 = arith.cmpi slt, %40, %c0_i32_20 : i32
    %48 = vector.broadcast %47 : i1 to vector<72x1xi1>
    %49 = vector.broadcast %48 : vector<72x1xi1> to vector<72x1xi1>
    %50 = arith.xori %46, %49 : vector<72x1xi1>
    %51 = arith.andi %50, %44 : vector<72x1xi1>
    %52 = vector.broadcast %40 : i32 to vector<72x1xi32>
    %53 = arith.addi %42, %52 : vector<72x1xi32>
    %54 = arith.select %51, %53, %42 : vector<72x1xi1>, vector<72x1xi32>
    %c8_i32 = arith.constant 8 : i32
    %55 = vector.broadcast %c8_i32 : i32 to vector<72x1xi32>
    %56 = arith.cmpi slt, %54, %55 : vector<72x1xi32>
    %cst_21 = arith.constant 0.000000e+00 : f32
    %57 = vector.shape_cast %56 : vector<72x1xi1> to vector<72x1xi1>
    %58 = vector.broadcast %57 : vector<72x1xi1> to vector<72x8xi1>
    %59 = vector.broadcast %cst_21 : f32 to vector<72x8xf32>
    %60 = arith.select %58, %37, %59 : vector<72x8xi1>, vector<72x8xf32>
    %cst_22 = arith.constant 0.000000e+00 : bf16
    %61 = vector.broadcast %cst_22 : bf16 to vector<16x8xbf16>
    %c0_23 = arith.constant 0 : index
    %c0_24 = arith.constant 0 : index
    %62 = vector.load %arg11[%c0_23, %c0_24] : memref<104x8xbf16, #tpu.memory_space<vmem>>, vector<16x8xbf16>
    tpu.vector_store %arg11[%c0_23, %c0_24], %61 {strides = array<i32>} : memref<104x8xbf16, #tpu.memory_space<vmem>>, vector<16x8xbf16>,
    %cst_25 = arith.constant 0.000000e+00 : bf16
    %63 = vector.broadcast %cst_25 : bf16 to vector<16x8xbf16>
    %c88 = arith.constant 88 : index
    %c0_26 = arith.constant 0 : index
    %64 = vector.load %arg11[%c88, %c0_26] : memref<104x8xbf16, #tpu.memory_space<vmem>>, vector<16x8xbf16>
    tpu.vector_store %arg11[%c88, %c0_26], %63 {strides = array<i32>} : memref<104x8xbf16, #tpu.memory_space<vmem>>, vector<16x8xbf16>,
    %65 = arith.truncf %60 : vector<72x8xf32> to vector<72x8xbf16>
    %c16 = arith.constant 16 : index
    %c0_27 = arith.constant 0 : index
    %66 = vector.load %arg11[%c16, %c0_27] : memref<104x8xbf16, #tpu.memory_space<vmem>>, vector<72x8xbf16>
    tpu.vector_store %arg11[%c16, %c0_27], %65 {strides = array<i32>} : memref<104x8xbf16, #tpu.memory_space<vmem>>, vector<72x8xbf16>,
    %c6 = arith.constant 6 : index
    %c0_28 = arith.constant 0 : index
    %67 = vector.load %arg11[%c6, %c0_28] : memref<104x8xbf16, #tpu.memory_space<vmem>>, vector<72x8xbf16>
    %c0_29 = arith.constant 0 : index
    %c0_30 = arith.constant 0 : index
    %c0_31 = arith.constant 0 : index
    %68 = vector.load %arg6[%c0_29, %c0_30, %c0_31] : memref<9x8x128xbf16, #tpu.memory_space<vmem>>, vector<1x8x128xbf16>
    %69 = vector.shape_cast %68 : vector<1x8x128xbf16> to vector<8x128xbf16>
    %cst_32 = arith.constant dense<0.000000e+00> : vector<72x128xf32>
    %70 = tpu.matmul %67, %69, %cst_32 {dimension_numbers = #tpu.dot_dimension_numbers<[1], [0], [0], [1], [0, 0, 1, 1], [], []>} : vector<72x8xbf16>, vector<8x128xbf16>, vector<72x128xf32> -> vector<72x128xf32>
    %c0_33 = arith.constant 0 : index
    %c0_34 = arith.constant 0 : index
    %71 = vector.load %arg12[%c0_33, %c0_34] : memref<72x128xf32, #tpu.memory_space<vmem>>, vector<72x128xf32>
    tpu.vector_store %arg12[%c0_33, %c0_34], %70 {strides = array<i32>} : memref<72x128xf32, #tpu.memory_space<vmem>>, vector<72x128xf32>,
    %c7 = arith.constant 7 : index
    %c0_35 = arith.constant 0 : index
    %72 = vector.load %arg11[%c7, %c0_35] : memref<104x8xbf16, #tpu.memory_space<vmem>>, vector<72x8xbf16>
    %c1 = arith.constant 1 : index
    %c0_36 = arith.constant 0 : index
    %c0_37 = arith.constant 0 : index
    %73 = vector.load %arg6[%c1, %c0_36, %c0_37] : memref<9x8x128xbf16, #tpu.memory_space<vmem>>, vector<1x8x128xbf16>
    %74 = vector.shape_cast %73 : vector<1x8x128xbf16> to vector<8x128xbf16>
    %cst_38 = arith.constant dense<0.000000e+00> : vector<72x128xf32>
    %75 = tpu.matmul %72, %74, %cst_38 {dimension_numbers = #tpu.dot_dimension_numbers<[1], [0], [0], [1], [0, 0, 1, 1], [], []>} : vector<72x8xbf16>, vector<8x128xbf16>, vector<72x128xf32> -> vector<72x128xf32>
    %c0_39 = arith.constant 0 : index
    %c0_40 = arith.constant 0 : index
    %76 = vector.load %arg12[%c0_39, %c0_40] : memref<72x128xf32, #tpu.memory_space<vmem>>, vector<72x128xf32>
    %77 = arith.addf %76, %75 : vector<72x128xf32>
    %c0_41 = arith.constant 0 : index
    %c0_42 = arith.constant 0 : index
    %78 = vector.load %arg12[%c0_41, %c0_42] : memref<72x128xf32, #tpu.memory_space<vmem>>, vector<72x128xf32>
    tpu.vector_store %arg12[%c0_41, %c0_42], %77 {strides = array<i32>} : memref<72x128xf32, #tpu.memory_space<vmem>>, vector<72x128xf32>,
    %c8 = arith.constant 8 : index
    %c0_43 = arith.constant 0 : index
    %79 = vector.load %arg11[%c8, %c0_43] : memref<104x8xbf16, #tpu.memory_space<vmem>>, vector<72x8xbf16>
    %c2 = arith.constant 2 : index
    %c0_44 = arith.constant 0 : index
    %c0_45 = arith.constant 0 : index
    %80 = vector.load %arg6[%c2, %c0_44, %c0_45] : memref<9x8x128xbf16, #tpu.memory_space<vmem>>, vector<1x8x128xbf16>
    %81 = vector.shape_cast %80 : vector<1x8x128xbf16> to vector<8x128xbf16>
    %cst_46 = arith.constant dense<0.000000e+00> : vector<72x128xf32>
    %82 = tpu.matmul %79, %81, %cst_46 {dimension_numbers = #tpu.dot_dimension_numbers<[1], [0], [0], [1], [0, 0, 1, 1], [], []>} : vector<72x8xbf16>, vector<8x128xbf16>, vector<72x128xf32> -> vector<72x128xf32>
    %c0_47 = arith.constant 0 : index
    %c0_48 = arith.constant 0 : index
    %83 = vector.load %arg12[%c0_47, %c0_48] : memref<72x128xf32, #tpu.memory_space<vmem>>, vector<72x128xf32>
    %84 = arith.addf %83, %82 : vector<72x128xf32>
    %c0_49 = arith.constant 0 : index
    %c0_50 = arith.constant 0 : index
    %85 = vector.load %arg12[%c0_49, %c0_50] : memref<72x128xf32, #tpu.memory_space<vmem>>, vector<72x128xf32>
    tpu.vector_store %arg12[%c0_49, %c0_50], %84 {strides = array<i32>} : memref<72x128xf32, #tpu.memory_space<vmem>>, vector<72x128xf32>,
    %c15 = arith.constant 15 : index
    %c0_51 = arith.constant 0 : index
    %86 = vector.load %arg11[%c15, %c0_51] : memref<104x8xbf16, #tpu.memory_space<vmem>>, vector<72x8xbf16>
    %c3 = arith.constant 3 : index
    %c0_52 = arith.constant 0 : index
    %c0_53 = arith.constant 0 : index
    %87 = vector.load %arg6[%c3, %c0_52, %c0_53] : memref<9x8x128xbf16, #tpu.memory_space<vmem>>, vector<1x8x128xbf16>
    %88 = vector.shape_cast %87 : vector<1x8x128xbf16> to vector<8x128xbf16>
    %cst_54 = arith.constant dense<0.000000e+00> : vector<72x128xf32>
    %89 = tpu.matmul %86, %88, %cst_54 {dimension_numbers = #tpu.dot_dimension_numbers<[1], [0], [0], [1], [0, 0, 1, 1], [], []>} : vector<72x8xbf16>, vector<8x128xbf16>, vector<72x128xf32> -> vector<72x128xf32>
    %c0_55 = arith.constant 0 : index
    %c0_56 = arith.constant 0 : index
    %90 = vector.load %arg12[%c0_55, %c0_56] : memref<72x128xf32, #tpu.memory_space<vmem>>, vector<72x128xf32>
    %91 = arith.addf %90, %89 : vector<72x128xf32>
    %c0_57 = arith.constant 0 : index
    %c0_58 = arith.constant 0 : index
    %92 = vector.load %arg12[%c0_57, %c0_58] : memref<72x128xf32, #tpu.memory_space<vmem>>, vector<72x128xf32>
    tpu.vector_store %arg12[%c0_57, %c0_58], %91 {strides = array<i32>} : memref<72x128xf32, #tpu.memory_space<vmem>>, vector<72x128xf32>,
    %c16_59 = arith.constant 16 : index
    %c0_60 = arith.constant 0 : index
    %93 = vector.load %arg11[%c16_59, %c0_60] : memref<104x8xbf16, #tpu.memory_space<vmem>>, vector<72x8xbf16>
    %c4 = arith.constant 4 : index
    %c0_61 = arith.constant 0 : index
    %c0_62 = arith.constant 0 : index
    %94 = vector.load %arg6[%c4, %c0_61, %c0_62] : memref<9x8x128xbf16, #tpu.memory_space<vmem>>, vector<1x8x128xbf16>
    %95 = vector.shape_cast %94 : vector<1x8x128xbf16> to vector<8x128xbf16>
    %cst_63 = arith.constant dense<0.000000e+00> : vector<72x128xf32>
    %96 = tpu.matmul %93, %95, %cst_63 {dimension_numbers = #tpu.dot_dimension_numbers<[1], [0], [0], [1], [0, 0, 1, 1], [], []>} : vector<72x8xbf16>, vector<8x128xbf16>, vector<72x128xf32> -> vector<72x128xf32>
    %c0_64 = arith.constant 0 : index
    %c0_65 = arith.constant 0 : index
    %97 = vector.load %arg12[%c0_64, %c0_65] : memref<72x128xf32, #tpu.memory_space<vmem>>, vector<72x128xf32>
    %98 = arith.addf %97, %96 : vector<72x128xf32>
    %c0_66 = arith.constant 0 : index
    %c0_67 = arith.constant 0 : index
    %99 = vector.load %arg12[%c0_66, %c0_67] : memref<72x128xf32, #tpu.memory_space<vmem>>, vector<72x128xf32>
    tpu.vector_store %arg12[%c0_66, %c0_67], %98 {strides = array<i32>} : memref<72x128xf32, #tpu.memory_space<vmem>>, vector<72x128xf32>,
    %c17 = arith.constant 17 : index
    %c0_68 = arith.constant 0 : index
    %100 = vector.load %arg11[%c17, %c0_68] : memref<104x8xbf16, #tpu.memory_space<vmem>>, vector<72x8xbf16>
    %c5 = arith.constant 5 : index
    %c0_69 = arith.constant 0 : index
    %c0_70 = arith.constant 0 : index
    %101 = vector.load %arg6[%c5, %c0_69, %c0_70] : memref<9x8x128xbf16, #tpu.memory_space<vmem>>, vector<1x8x128xbf16>
    %102 = vector.shape_cast %101 : vector<1x8x128xbf16> to vector<8x128xbf16>
    %cst_71 = arith.constant dense<0.000000e+00> : vector<72x128xf32>
    %103 = tpu.matmul %100, %102, %cst_71 {dimension_numbers = #tpu.dot_dimension_numbers<[1], [0], [0], [1], [0, 0, 1, 1], [], []>} : vector<72x8xbf16>, vector<8x128xbf16>, vector<72x128xf32> -> vector<72x128xf32>
    %c0_72 = arith.constant 0 : index
    %c0_73 = arith.constant 0 : index
    %104 = vector.load %arg12[%c0_72, %c0_73] : memref<72x128xf32, #tpu.memory_space<vmem>>, vector<72x128xf32>
    %105 = arith.addf %104, %103 : vector<72x128xf32>
    %c0_74 = arith.constant 0 : index
    %c0_75 = arith.constant 0 : index
    %106 = vector.load %arg12[%c0_74, %c0_75] : memref<72x128xf32, #tpu.memory_space<vmem>>, vector<72x128xf32>
    tpu.vector_store %arg12[%c0_74, %c0_75], %105 {strides = array<i32>} : memref<72x128xf32, #tpu.memory_space<vmem>>, vector<72x128xf32>,
    %c24 = arith.constant 24 : index
    %c0_76 = arith.constant 0 : index
    %107 = vector.load %arg11[%c24, %c0_76] : memref<104x8xbf16, #tpu.memory_space<vmem>>, vector<72x8xbf16>
    %c6_77 = arith.constant 6 : index
    %c0_78 = arith.constant 0 : index
    %c0_79 = arith.constant 0 : index
    %108 = vector.load %arg6[%c6_77, %c0_78, %c0_79] : memref<9x8x128xbf16, #tpu.memory_space<vmem>>, vector<1x8x128xbf16>
    %109 = vector.shape_cast %108 : vector<1x8x128xbf16> to vector<8x128xbf16>
    %cst_80 = arith.constant dense<0.000000e+00> : vector<72x128xf32>
    %110 = tpu.matmul %107, %109, %cst_80 {dimension_numbers = #tpu.dot_dimension_numbers<[1], [0], [0], [1], [0, 0, 1, 1], [], []>} : vector<72x8xbf16>, vector<8x128xbf16>, vector<72x128xf32> -> vector<72x128xf32>
    %c0_81 = arith.constant 0 : index
    %c0_82 = arith.constant 0 : index
    %111 = vector.load %arg12[%c0_81, %c0_82] : memref<72x128xf32, #tpu.memory_space<vmem>>, vector<72x128xf32>
    %112 = arith.addf %111, %110 : vector<72x128xf32>
    %c0_83 = arith.constant 0 : index
    %c0_84 = arith.constant 0 : index
    %113 = vector.load %arg12[%c0_83, %c0_84] : memref<72x128xf32, #tpu.memory_space<vmem>>, vector<72x128xf32>
    tpu.vector_store %arg12[%c0_83, %c0_84], %112 {strides = array<i32>} : memref<72x128xf32, #tpu.memory_space<vmem>>, vector<72x128xf32>,
    %c25 = arith.constant 25 : index
    %c0_85 = arith.constant 0 : index
    %114 = vector.load %arg11[%c25, %c0_85] : memref<104x8xbf16, #tpu.memory_space<vmem>>, vector<72x8xbf16>
    %c7_86 = arith.constant 7 : index
    %c0_87 = arith.constant 0 : index
    %c0_88 = arith.constant 0 : index
    %115 = vector.load %arg6[%c7_86, %c0_87, %c0_88] : memref<9x8x128xbf16, #tpu.memory_space<vmem>>, vector<1x8x128xbf16>
    %116 = vector.shape_cast %115 : vector<1x8x128xbf16> to vector<8x128xbf16>
    %cst_89 = arith.constant dense<0.000000e+00> : vector<72x128xf32>
    %117 = tpu.matmul %114, %116, %cst_89 {dimension_numbers = #tpu.dot_dimension_numbers<[1], [0], [0], [1], [0, 0, 1, 1], [], []>} : vector<72x8xbf16>, vector<8x128xbf16>, vector<72x128xf32> -> vector<72x128xf32>
    %c0_90 = arith.constant 0 : index
    %c0_91 = arith.constant 0 : index
    %118 = vector.load %arg12[%c0_90, %c0_91] : memref<72x128xf32, #tpu.memory_space<vmem>>, vector<72x128xf32>
    %119 = arith.addf %118, %117 : vector<72x128xf32>
    %c0_92 = arith.constant 0 : index
    %c0_93 = arith.constant 0 : index
    %120 = vector.load %arg12[%c0_92, %c0_93] : memref<72x128xf32, #tpu.memory_space<vmem>>, vector<72x128xf32>
    tpu.vector_store %arg12[%c0_92, %c0_93], %119 {strides = array<i32>} : memref<72x128xf32, #tpu.memory_space<vmem>>, vector<72x128xf32>,
    %c26 = arith.constant 26 : index
    %c0_94 = arith.constant 0 : index
    %121 = vector.load %arg11[%c26, %c0_94] : memref<104x8xbf16, #tpu.memory_space<vmem>>, vector<72x8xbf16>
    %c8_95 = arith.constant 8 : index
    %c0_96 = arith.constant 0 : index
    %c0_97 = arith.constant 0 : index
    %122 = vector.load %arg6[%c8_95, %c0_96, %c0_97] : memref<9x8x128xbf16, #tpu.memory_space<vmem>>, vector<1x8x128xbf16>
    %123 = vector.shape_cast %122 : vector<1x8x128xbf16> to vector<8x128xbf16>
    %cst_98 = arith.constant dense<0.000000e+00> : vector<72x128xf32>
    %124 = tpu.matmul %121, %123, %cst_98 {dimension_numbers = #tpu.dot_dimension_numbers<[1], [0], [0], [1], [0, 0, 1, 1], [], []>} : vector<72x8xbf16>, vector<8x128xbf16>, vector<72x128xf32> -> vector<72x128xf32>
    %c0_99 = arith.constant 0 : index
    %c0_100 = arith.constant 0 : index
    %125 = vector.load %arg12[%c0_99, %c0_100] : memref<72x128xf32, #tpu.memory_space<vmem>>, vector<72x128xf32>
    %126 = arith.addf %125, %124 : vector<72x128xf32>
    %c0_101 = arith.constant 0 : index
    %c0_102 = arith.constant 0 : index
    %127 = vector.load %arg12[%c0_101, %c0_102] : memref<72x128xf32, #tpu.memory_space<vmem>>, vector<72x128xf32>
    tpu.vector_store %arg12[%c0_101, %c0_102], %126 {strides = array<i32>} : memref<72x128xf32, #tpu.memory_space<vmem>>, vector<72x128xf32>,
    %c0_103 = arith.constant 0 : index
    %c0_104 = arith.constant 0 : index
    %128 = vector.load %arg12[%c0_103, %c0_104] : memref<72x128xf32, #tpu.memory_space<vmem>>, vector<72x128xf32>
    %cst_105 = arith.constant 0.000000e+00 : f32
    %129 = vector.shape_cast %56 : vector<72x1xi1> to vector<72x1xi1>
    %130 = vector.broadcast %129 : vector<72x1xi1> to vector<72x128xi1>
    %131 = vector.broadcast %cst_105 : f32 to vector<72x128xf32>
    %132 = arith.select %130, %128, %131 : vector<72x128xi1>, vector<72x128xf32>
    %c0_106 = arith.constant 0 : index
    %c0_107 = arith.constant 0 : index
    %133 = vector.load %arg7[%c0_106, %c0_107] : memref<128x128xf32, #tpu.memory_space<vmem>>, vector<128x128xf32>
    %c0_108 = arith.constant 0 : index
    %c0_109 = arith.constant 0 : index
    %134 = vector.load %arg8[%c0_108, %c0_109] : memref<1x128xf32, #tpu.memory_space<vmem>>, vector<1x128xf32>
    %c0_110 = arith.constant 0 : index
    %c0_111 = arith.constant 0 : index
    %135 = vector.load %arg9[%c0_110, %c0_111] : memref<1x128xf32, #tpu.memory_space<vmem>>, vector<1x128xf32>
    %cst_112 = arith.constant dense<0.000000e+00> : vector<128xf32>
    %136 = vector.multi_reduction <add>, %132, %cst_112 [0] : vector<72x128xf32> to vector<128xf32>
    %137 = vector.shape_cast %136 : vector<128xf32> to vector<1x128xf32>
    %cst_113 = arith.constant dense<0.000000e+00> : vector<1x128xf32>
    %138 = tpu.matmul %137, %133, %cst_113 {dimension_numbers = #tpu.dot_dimension_numbers<[1], [0], [0], [1], [0, 0, 1, 1], [], []>} : vector<1x128xf32>, vector<128x128xf32>, vector<1x128xf32> -> vector<1x128xf32>
    %139 = vector.broadcast %138 : vector<1x128xf32> to vector<72x128xf32>
    %140 = arith.subf %132, %139 : vector<72x128xf32>
    %141 = arith.mulf %140, %140 : vector<72x128xf32>
    %cst_114 = arith.constant dense<0.000000e+00> : vector<128xf32>
    %142 = vector.multi_reduction <add>, %141, %cst_114 [0] : vector<72x128xf32> to vector<128xf32>
    %143 = vector.shape_cast %142 : vector<128xf32> to vector<1x128xf32>
    %cst_115 = arith.constant dense<0.000000e+00> : vector<1x128xf32>
    %144 = tpu.matmul %143, %133, %cst_115 {dimension_numbers = #tpu.dot_dimension_numbers<[1], [0], [0], [1], [0, 0, 1, 1], [], []>} : vector<1x128xf32>, vector<128x128xf32>, vector<1x128xf32> -> vector<1x128xf32>
    %145 = arith.mulf %138, %138 : vector<1x128xf32>
    %cst_116 = arith.constant 1.250000e-01 : f32
    %146 = vector.broadcast %cst_116 : f32 to vector<1x128xf32>
    %147 = arith.mulf %145, %146 : vector<1x128xf32>
    %148 = arith.subf %144, %147 : vector<1x128xf32>
    %cst_117 = arith.constant 0.000000e+00 : f32
    %149 = vector.broadcast %cst_117 : f32 to vector<1x128xf32>
    %150 = arith.maximumf %148, %149 : vector<1x128xf32>
    %cst_118 = arith.constant 9.99999974E-6 : f32
    %151 = vector.broadcast %cst_118 : f32 to vector<1x128xf32>
    %152 = arith.addf %150, %151 : vector<1x128xf32>
    %153 = math.rsqrt %152 : vector<1x128xf32>
    %154 = vector.broadcast %153 : vector<1x128xf32> to vector<72x128xf32>
    %155 = arith.mulf %140, %154 : vector<72x128xf32>
    %156 = vector.broadcast %134 : vector<1x128xf32> to vector<72x128xf32>
    %157 = arith.mulf %155, %156 : vector<72x128xf32>
    %158 = vector.broadcast %135 : vector<1x128xf32> to vector<72x128xf32>
    %159 = arith.addf %157, %158 : vector<72x128xf32>
    %160 = arith.negf %159 : vector<72x128xf32>
    %161 = math.exp %160 : vector<72x128xf32>
    %cst_119 = arith.constant 1.000000e+00 : f32
    %162 = vector.broadcast %cst_119 : f32 to vector<72x128xf32>
    %163 = arith.addf %162, %161 : vector<72x128xf32>
    %164 = arith.divf %162, %163 : vector<72x128xf32>
    %165 = arith.mulf %159, %164 : vector<72x128xf32>
    %166 = arith.addf %165, %1 : vector<72x128xf32>
    %c0_120 = arith.constant 0 : index
    %c0_121 = arith.constant 0 : index
    %c0_122 = arith.constant 0 : index
    %167 = vector.load %arg10[%c0_120, %c0_121, %c0_122] : memref<1x72x128xf32, #tpu.memory_space<vmem>>, vector<1x72x128xf32>
    %168 = vector.shape_cast %167 : vector<1x72x128xf32> to vector<72x128xf32>
    %169 = vector.shape_cast %166 : vector<72x128xf32> to vector<1x72x128xf32>
    tpu.vector_store %arg10[%c0_120, %c0_121, %c0_122], %169 {strides = array<i32>} : memref<1x72x128xf32, #tpu.memory_space<vmem>>, vector<1x72x128xf32>,
    return
  }
  func.func @transform_0(%arg0: i32) -> (i32, i32, i32) {
    %c0_i32 = arith.constant 0 : i32
    %c0_i32_0 = arith.constant 0 : i32
    %c0_i32_1 = arith.constant 0 : i32
    return %arg0, %c0_i32, %c0_i32_0 : i32, i32, i32
  }
  func.func @transform_1(%arg0: i32) -> (i32, i32) {
    %c0_i32 = arith.constant 0 : i32
    %c0_i32_0 = arith.constant 0 : i32
    %c0_i32_1 = arith.constant 0 : i32
    return %c0_i32, %c0_i32_0 : i32, i32
  }
  func.func @transform_2(%arg0: i32) -> (i32, i32) {
    %c0_i32 = arith.constant 0 : i32
    %c0_i32_0 = arith.constant 0 : i32
    %c0_i32_1 = arith.constant 0 : i32
    return %c0_i32, %c0_i32_0 : i32, i32
  }
  func.func @transform_3(%arg0: i32) -> (i32, i32) {
    %c0_i32 = arith.constant 0 : i32
    %c0_i32_0 = arith.constant 0 : i32
    %c0_i32_1 = arith.constant 0 : i32
    return %c0_i32, %c0_i32_0 : i32, i32
  }
  func.func @transform_4(%arg0: i32) -> (i32, i32) {
    %c0_i32 = arith.constant 0 : i32
    %c0_i32_0 = arith.constant 0 : i32
    %c0_i32_1 = arith.constant 0 : i32
    return %c0_i32, %c0_i32_0 : i32, i32
  }
  func.func @transform_5(%arg0: i32) -> (i32, i32, i32) {
    %c0_i32 = arith.constant 0 : i32
    %c0_i32_0 = arith.constant 0 : i32
    %c0_i32_1 = arith.constant 0 : i32
    %c0_i32_2 = arith.constant 0 : i32
    return %c0_i32, %c0_i32_0, %c0_i32_1 : i32, i32, i32
  }
  func.func @transform_6(%arg0: i32) -> (i32, i32) {
    %c0_i32 = arith.constant 0 : i32
    %c0_i32_0 = arith.constant 0 : i32
    %c0_i32_1 = arith.constant 0 : i32
    return %c0_i32, %c0_i32_0 : i32, i32
  }
  func.func @transform_7(%arg0: i32) -> (i32, i32) {
    %c0_i32 = arith.constant 0 : i32
    %c0_i32_0 = arith.constant 0 : i32
    %c0_i32_1 = arith.constant 0 : i32
    return %c0_i32, %c0_i32_0 : i32, i32
  }
  func.func @transform_8(%arg0: i32) -> (i32, i32) {
    %c0_i32 = arith.constant 0 : i32
    %c0_i32_0 = arith.constant 0 : i32
    %c0_i32_1 = arith.constant 0 : i32
    return %c0_i32, %c0_i32_0 : i32, i32
  }
  func.func @transform_9(%arg0: i32) -> (i32, i32, i32) {
    %c0_i32 = arith.constant 0 : i32
    %c0_i32_0 = arith.constant 0 : i32
    %c0_i32_1 = arith.constant 0 : i32
    return %arg0, %c0_i32, %c0_i32_0 : i32, i32, i32
  }
}

</mosaic_0001>

<bundles_post_ra>
// kernel: tpu_custom_call.1
= control target key start
LH: loop header
LB: loop body
LE: loop exit
PB: predicated region body
PF: predicated region fallthrough
CT: control target
= control target key end

     0   :  { %s4769_s0 = inlined_call_operand.hbm [shape: f32[2,72,128], index: 0, kind: input, shape index: {}]   ;;  %s4770_s1 = inlined_call_operand.vmem [shape: bf16[128,8], index: 1, kind: input, shape index: {}]   ;;  %s4771_s2 = inlined_call_operand.vmem [shape: f32[8,8], index: 2, kind: input, shape index: {}]   ;;  %s4772_s3 = inlined_call_operand.vmem [shape: f32[1,8], index: 3, kind: input, shape index: {}]   ;;  %s4773_s4 = inlined_call_operand.vmem [shape: f32[1,8], index: 4, kind: input, shape index: {}]   ;;  %s4774_s5 = inlined_call_operand.vmem [shape: bf16[9,8,128], index: 5, kind: input, shape index: {}]   ;;  %s4775_s6 = inlined_call_operand.hbm [shape: f32[128,128], index: 6, kind: input, shape index: {}]   ;;  %s4776_s7 = inlined_call_operand.vmem [shape: f32[1,128], index: 7, kind: input, shape index: {}]   ;;  %s4777_s8 = inlined_call_operand.vmem [shape: f32[1,128], index: 8, kind: input, shape index: {}]   ;;  %s4778_s9 = inlined_call_operand.hbm [shape: f32[2,72,128], index: 9, kind: output, shape index: {}]  }
   0x1   :  { %4793 = sst [smem:[#allocation17_spill]] %s4775_s6 }
   0x2   :  { %14 = vsyncpa [#allocation5], 0 }
   0x3   :  { %16 = vsyncpa [#allocation5 + $0x1], 0 }
   0x4   :  { %17 = vsyncpa [#allocation8], 0 }
   0x5   :  { %18 = vsyncpa [#allocation6], 0 }
   0x6   :  { %20 = vsyncpa [#allocation6 + $0x1], 0  ;;  %s3544_s30 = smov 0   ;;  %s3546_s10 = smov 0  }
   0x7   :  { %s3548_s11 = smov 0   ;;  %s3550_s12 = smov 0  }
   0x8 LB: > { %4794 = sst [smem:[#allocation13_spill]] %s3482_s11  ;;  %s3565_s13 = sadd.s32 4294967295, %s3486_s12   ;;  %s3486_s12 = sphi %s3550_s12, %s4943_s12   ;;  %s3482_s11 = sphi %s3548_s11, %s4945_s11   ;;  %s3478_s10 = sphi %s3546_s10, %s4947_s10   ;;  %s3474_s30 = sphi %s3544_s30, %s4946_s30  }
   0x9   : > { %4795 = sst [smem:[#allocation14_spill]] %s3486_s12  ;;  %s2866_s14 = sadd.s32 4294967294, %s3486_s12  }
   0xa   : > { %p46_p0 = scmp.ne.s32.totalorder %s3478_s10, %s3474_s30  ;;  %p47_p1 = scmp.eq.s32.totalorder %s3565_s13, 0 }
   0xb   : > { %p238_p2 = scmp.eq.s32.totalorder %s3565_s13, 1  ;;  %p244_p3 = scmp.eq.s32.totalorder %s2866_s14, 1 }
   0xc   : > { %p3574_p4 = por %p47_p1, %p46_p0  ;;  %p2867_p5 = scmp.ge.s32.totalorder %s3486_s12, 1 }
   0xd   : > { %p3579_p6 = por %p244_p3, %p46_p0  ;;  %p251_p7 = scmp.lt.s32.totalorder %s3486_s12, 3 }
   0xe   : > { %s4798_s6 = sld [smem:[#allocation17_spill]]  ;;  %s3488_s21 = smov [#allocation7]  }
   0xf   : > { %p3587_p8 = pnand %p2867_p5, %p251_p7  ;;  %s279_s22 = sshll.u32 %s3488_s21, 4  ;;  %s280_s22 = int_to_ptr.vmem [resolvable:$true] %s279_s22 }
  0x10   : > { %s3597_s23 = sadd.s32 1, %s3486_s12   ;;  %s4779_s24 = smov 128  }
  0x11   : > { %p3213_p9 = pneg %p3587_p8  ;;  %4800 = sst [smem:[#allocation15_spill]] %s3597_s23 }
  0x12   : > { %s4780_s25 = smov 8   ;;  %s30_s26 = ssub.s32 %s3486_s12, %s3597_s23 }
  0x13   : > { %p3214_p10 = pnand %p3213_p9, %p47_p1  ;;  %s33_s27 = sadd.s32 1, %s3482_s11 }
  0x14   : > { %s277_s19 = sshll.u32 %s4798_s6, 4  ;;  %p31_p12 = scmp.eq.s32.totalorder %s30_s26, 0  ;;  %s278_s19 = int_to_ptr.hbm [resolvable:$true] %s277_s19 }
  0x15   : > { %3216 = dma.hbm_to_vmem [thread:$0]  (!%p3214_p10), %s278_s19, 2048, %s280_s22, [#allocation8], %s4779_s24, %s4779_s24, %s4780_s25  }
  0x16   : > { %p40_p13 = scmp.ne.s32.totalorder %s3482_s11, %s3478_s10  ;;  %p41_p0 = scmp.eq.s32.totalorder %s3486_s12, 0 }
  0x17   : > { %p3226_p3 = scmp.lt.s32.totalorder %s3486_s12, 2  ;;  %s299_s14 = sand.u32 1, %s3482_s11  }
  0x18   : > { %s3610_s28 = scalar_select %p31_p12, %s3482_s11, %s33_s27  }
  0x19   : > { %p42_p5 = por %p41_p0, %p40_p13  ;;  %p3614_p7 = por %p238_p2, %p40_p13 }
  0x1a   : > { %4801 = sst [smem:[#allocation16_spill]] %s3610_s28  ;;  %s3202_s17 = smul.u32 72, %s3486_s12 }
  0x1b   : > { %s3201_s18 = smul.u32 72, %s299_s14  ;;  %p3623_p9 = pnand %p3226_p3, %p42_p5 }
  0x1c   : > { %s308_s19 = scalar_lea.hbm %s4769_s0, %s3202_s17  ;;  %s300_s25 = scalar_lea.sflag [#allocation5], %s299_s14 }
  0x1d   : > { %s309_s26 = sshll.u32 %s308_s19, 4  ;;  %s303_s27 = scalar_lea.vmem [#allocation4], %s3201_s18  ;;  %s310_s26 = int_to_ptr.hbm [resolvable:$true] %s309_s26 }
  0x1e   : > { %s311_s24 = sshll.u32 %s303_s27, 4  ;;  %s3386_s28 = sshra.s32 %s310_s26, 4  ;;  %s312_s24 = int_to_ptr.vmem [resolvable:$true] %s311_s24  ;;  %s3387_s28 = int_to_ptr.hbm [resolvable:$true] %s3386_s28 }
  0x1f   : > { %s3388_s11 = scalar_lea.hbm %s3387_s28, 72  ;;  %p3390_p10 = pneg %p3623_p9 }
  0x20   : > { %p3389_p2 = scmp.ne.s32.totalorder %s3387_s28, %s3388_s11  ;;  %s3393_s21 = scalar_lea.hbm %s4769_s0, 144 }
  0x21   : > { %p3394_p0 = scmp.lt.s32.totalorder %s3387_s28, %s4769_s0  ;;  %p3395_p3 = scmp.lt.s32.totalorder %s3393_s21, %s3388_s11 }
  0x22   : > { %p3391_p12 = pnand %p3390_p10, %p3389_p2 }
  0x23   : > { %p3396_p5 = por %p3395_p3, %p3394_p0 }
  0x24   : > { %p3392_p13 = pneg %p3391_p12 }
  0x26   : > { %p3397_p11 = pnand %p3396_p5, %p3392_p13 }
  0x28   : > { %3400 = shalt.err (!%p3397_p11)
}
  0x29   : > { %s4804_s14 = smov 8   ;;  %s4805_s18 = smov 128  }
  0x2a   : > { %3220 = dma.hbm_to_vmem [thread:$0]  (!%p3623_p9), %s310_s26, 1152, %s312_s24, %s300_s25, %s4805_s18, %s4805_s18, %s4804_s14  }
  0x2b   : > { %323 = sbr.rel (%p3587_p8) target bundleno = 1435 (0x59b), region = 56  ;;  %s3643_s19 = sand.u32 (!%p3587_p8), 1, %s3478_s10  }
  0x2c   : > { %s3203_s11 = smul.u32 (!%p3587_p8), 72, %s3643_s19  ;;  %s326_s12 = scalar_lea.sflag (!%p3587_p8), [#allocation5], %s3643_s19 }
  0x2e   : > { %s3649_s23 = scalar_lea.vmem (!%p3587_p8), [#allocation4], %s3203_s11 }
  0x30   : > { %3461 = dma.done.wait (%p3574_p4), %s326_s12, 1152  }
  0x31   : > { %3463 = vsyncadd (%p3574_p4), %s326_s12, 4294966144 }
  0x32   : > { %3465 = dma.done.wait (%p47_p1), [#allocation8], 2048  }
  0x33   : > { %3467 = vsyncadd (%p47_p1), [#allocation8], 4294965248  ;;  %v3156_v0 = vld [vmem:[%s4770_s1 + $0x38] sm:$0xff]  ;;  %v3155_v1 = vld [vmem:[%s4770_s1 + $0x30] sm:$0xff]  ;;  %vm4785_vm0 = vcmask 64512   ;;  %vm4789_vm1 = vcmask 1043456  }
  0x34   : > { %449 = vmatpush.bf16.msra.mxu0 %v3156_v0  ;;  %v3154_v2 = vld [vmem:[%s4770_s1 + $0x28] sm:$0xff]  ;;  %v3153_v3 = vld [vmem:[%s4770_s1 + $0x20] sm:$0xff]  ;;  %v3152_v4 = vld [vmem:[%s4770_s1 + $0x18] sm:$0xff]  ;;  %vm4786_vm9 = vcmask 60416   ;;  %s4710_s25 = scalar_lea.vmem [#allocation9], %s3203_s11  ;;  %s3204_s11 = smul.u32 72, %s3565_s13 }
  0x35   : > { %v3151_v5 = vld [vmem:[%s4770_s1 + $0x10] sm:$0xff]  ;;  %v3150_v6 = vld [vmem:[%s4770_s1 + $0x8] sm:$0xff]  ;;  %v3149_v7 = vld [vmem:[%s4770_s1] sm:$0xff]  ;;  %s2780_s22 = sshll.u32 %s4710_s25, 4  ;;  %s2768_s27 = scalar_lea.sflag [#allocation6], %s3643_s19  ;;  %s2781_s22 = int_to_ptr.vmem [resolvable:$true] %s2780_s22 }
  0x36   : > { %v371_v8 = vld [vmem:[%s3649_s23] sm:$0xff]  ;;  %v372_v9 = vld [vmem:[%s3649_s23 + $0x8] sm:$0xff]  ;;  %v373_v11 = vld [vmem:[%s3649_s23 + $0x10] sm:$0xff]  ;;  %s2779_s15 = scalar_lea.hbm %s4778_s9, %s3204_s11  ;;  %s3436_s18 = scalar_lea.hbm %s4778_s9, 144 }
  0x37   : > { %v380_v10 = vpack.c.bf16 %v372_v9, %v371_v8  ;;  %v374_v12 = vld [vmem:[%s3649_s23 + $0x18] sm:$0xff]  ;;  %v375_v14 = vld [vmem:[%s3649_s23 + $0x20] sm:$0xff]  ;;  %v376_v15 = vld [vmem:[%s3649_s23 + $0x28] sm:$0xff]  ;;  %s2782_s26 = sshll.u32 %s2779_s15, 4  ;;  %s2783_s26 = int_to_ptr.hbm [resolvable:$true] %s2782_s26 }
  0x38   : > { %450 = vmatpush.bf16.msra.mxu0 %v3155_v1  ;;  %v381_v13 = vpack.c.bf16 %v374_v12, %v373_v11  ;;  %v382_v16 = vpack.c.bf16 %v376_v15, %v375_v14  ;;  %v377_v17 = vld [vmem:[%s3649_s23 + $0x30] sm:$0xff]  ;;  %v378_v18 = vld [vmem:[%s3649_s23 + $0x38] sm:$0xff]  ;;  %v379_v20 = vld [vmem:[%s3649_s23 + $0x40] sm:$0xff]  ;;  %s3430_s6 = sshra.s32 %s2783_s26, 4  ;;  %s3431_s6 = int_to_ptr.hbm [resolvable:$true] %s3430_s6 }
  0x39   : > { %v383_v19 = vpack.c.bf16 %v378_v18, %v377_v17  ;;  %v384_v21 = vpack.c.bf16 %v379_v20, %v379_v20  ;;  %v482_v28 = vld [vmem:[%s4771_s2] sm:$0xff]  ;;  %s3432_s17 = scalar_lea.hbm %s3431_s6, 72  ;;  %p3437_p11 = scmp.lt.s32.totalorder %s3431_s6, %s4778_s9 }
  0x3a   : > { %527 = vmatpush.msra.mxu1 %v482_v28  ;;  %592 = vmatpush.msra.mxu2 %v482_v28  ;;  %p3433_p1 = scmp.ne.s32.totalorder %s3431_s6, %s3432_s17  ;;  %p3438_p9 = scmp.lt.s32.totalorder %s3436_s18, %s3432_s17 }
  0x3c   : > { %451 = vmatpush.bf16.msra.mxu0 %v3154_v2  ;;  %p3434_p4 = pnand %p3433_p1, %p3614_p7  ;;  %p3439_p2 = por %p3438_p9, %p3437_p11 }
  0x3e   : > { %p3435_p8 = pneg %p3434_p4 }
  0x40   : > { %452 = vmatpush.bf16.msra.mxu0 %v3153_v3  ;;  %p3440_p10 = pnand %p3439_p2, %p3435_p8 }
  0x44   : > { %453 = vmatpush.bf16.msra.mxu0 %v3152_v4 }
  0x48   : > { %454 = vmatpush.bf16.msra.mxu0 %v3151_v5 }
  0x4c   : > { %455 = vmatpush.bf16.msra.mxu0 %v3150_v6 }
  0x50   : > { %456 = vmatpush.bf16.msra.mxu0 %v3149_v7 }
  0x53   : > { %457 = vmatmul.bf16.vlgmr.msra.gmra.mxu0 %v380_v10 }
  0x63   : > { %462 = vmatmul.bf16.gmra.mxu0 %v381_v13 }
  0x73   : > { %467 = vmatmul.bf16.gmra.mxu0 %v382_v16 }
  0x83   : > { %472 = vmatmul.bf16.gmra.mxu0 %v383_v19 }
  0x93   : > { %477 = vmatmul.bf16.gmra.mxu0 %v384_v21 }
  0xd0   : > { %v458_v22 = vpop.f32.mrf.mxu0 }
  0xd1   : > { %v486_v31 = vsel %vm4785_vm0, %v458_v22, 0.0 }
  0xd8   : > { %v460_v23 = vpop.f32.mrf.mxu0 }
  0xd9   : > { %v487_v30 = vsel %vm4785_vm0, %v460_v23, 0.0 }
  0xda   : > { %v488_v33 = vadd.f32 %v487_v30, %v486_v31 }
  0xe0   : > { %v463_v24 = vpop.f32.mrf.mxu0 }
  0xe1   : > { %v489_v32 = vsel %vm4785_vm0, %v463_v24, 0.0 }
  0xe2   : > { %v490_v35 = vadd.f32 %v489_v32, %v488_v33 }
  0xe8   : > { %v465_v25 = vpop.f32.mrf.mxu0 }
  0xe9   : > { %v491_v34 = vsel %vm4785_vm0, %v465_v25, 0.0 }
  0xea   : > { %v492_v37 = vadd.f32 %v491_v34, %v490_v35 }
  0xf0   : > { %v468_v26 = vpop.f32.mrf.mxu0 }
  0xf1   : > { %v493_v36 = vsel %vm4785_vm0, %v468_v26, 0.0 }
  0xf2   : > { %v494_v40 = vadd.f32 %v493_v36, %v492_v37  ;;  %v1211_v36 = vld [vmem:[%s4774_s5] sm:$0xf] }
  0xf8   : > { %v470_v27 = vpop.f32.mrf.mxu0 }
  0xf9   : > { %v495_v39 = vsel %vm4785_vm0, %v470_v27, 0.0 }
  0xfa   : > { %v496_v42 = vadd.f32 %v495_v39, %v494_v40 }
 0x100   : > { %v473_v29 = vpop.f32.mrf.mxu0 }
 0x101   : > { %v497_v41 = vsel %vm4785_vm0, %v473_v29, 0.0 }
 0x102   : > { %v498_v44 = vadd.f32 %v497_v41, %v496_v42 }
 0x108   : > { %v475_v38 = vpop.f32.mrf.mxu0 }
 0x109   : > { %v499_v43 = vsel %vm4785_vm0, %v475_v38, 0.0 }
 0x10a   : > { %v500_v45 = vadd.f32 %v499_v43, %v498_v44  ;;  %v826_v43 = vlaneseq }
 0x10c   : > { %v3755_v44 = vshrl.u32 %v826_v43, 7 }
 0x110   : > { %v478_v46 = vpop.f32.mrf.mxu0 }
 0x111   : > { %v501_v47 = vsel %vm4785_vm0, %v478_v46, 0.0 }
 0x112   : > { %v502_v48 = vadd.f32 %v501_v47, %v500_v45  ;;  %v3758_v45 = vadd.s32 8, %v3755_v44  ;;  %v839_v47 = vand.u32 65535, %v3755_v44 }
 0x114   : > { %v503_v49 = vrot.slane %v502_v48, 4 }
 0x116   : > { %v504_v50 = vadd.f32 %v503_v49, %v502_v48  ;;  %v868_v48 = vand.u32 65535, %v3758_v45 }
 0x118   : > { %v505_v51 = vrot.slane %v504_v50, 2  ;;  %v480_v52 = vpop.f32.mrf.mxu0 }
 0x119   : > { %v843_v52 = vmul.u32 58254, %v839_v47 }
 0x11a   : > { %v506_v53 = vadd.f32 %v505_v51, %v504_v50  ;;  %v840_v51 = vshrl.u32 %v3755_v44, 16 }
 0x11c   : > { %v507_v54 = vrot.slane %v506_v53, 1 }
 0x11e   : > { %v508_v55 = vadd.f32 %v507_v54, %v506_v53  ;;  %v869_v53 = vshrl.u32 %v3758_v45, 16  ;;  %v872_v54 = vmul.u32 58254, %v868_v48 }
 0x120   : > { %2905 = vmatmul.msk.f32.vlgmr.msra.gmra.mxu1 %vm4785_vm0, %v508_v55 }
 0x19d   : > { %v529_v56 = vpop.f32.mrf.mxu1 }
 0x19e   : > { %v532_v57 = vperm.slane %v529_v56, 0  ;;  %v597_v35 = vmul.f32 %v529_v56, %v529_v56 }
 0x1a0   : > { %v3705_v58 = vsub.f32 %v458_v22, %v532_v57  ;;  %v3707_v59 = vsub.f32 %v460_v23, %v532_v57  ;;  %v3709_v60 = vsub.f32 %v463_v24, %v532_v57  ;;  %v3711_v61 = vsub.f32 %v465_v25, %v532_v57 }
 0x1a1   : > { %v3713_v62 = vsub.f32 %v468_v26, %v532_v57  ;;  %v3721_v2 = vsub.f32 %v470_v27, %v532_v57  ;;  %v3727_v7 = vsub.f32 %v473_v29, %v532_v57  ;;  %v3732_v11 = vsub.f32 %v475_v38, %v532_v57 }
 0x1a2   : > { %v542_v63 = vmul.f32 %v3705_v58, %v3705_v58  ;;  %v543_v0 = vmul.f32 %v3707_v59, %v3707_v59  ;;  %v544_v1 = vmul.f32 %v3709_v60, %v3709_v60  ;;  %v545_v3 = vmul.f32 %v3711_v61, %v3711_v61 }
 0x1a3   : > { %v546_v8 = vmul.f32 %v3713_v62, %v3713_v62  ;;  %v547_v12 = vmul.f32 %v3721_v2, %v3721_v2  ;;  %v3737_v15 = vsub.f32 %v478_v46, %v532_v57  ;;  %v548_v16 = vmul.f32 %v3727_v7, %v3727_v7 }
 0x1a4   : > { %v551_v4 = vsel %vm4785_vm0, %v542_v63, 0.0  ;;  %v552_v5 = vsel %vm4785_vm0, %v543_v0, 0.0  ;;  %v554_v9 = vsel %vm4785_vm0, %v544_v1, 0.0  ;;  %v556_v13 = vsel %vm4785_vm0, %v545_v3, 0.0 }
 0x1a5   : > { %v553_v6 = vadd.f32 %v552_v5, %v551_v4  ;;  %v558_v17 = vsel %vm4785_vm0, %v546_v8, 0.0  ;;  %v549_v19 = vmul.f32 %v3732_v11, %v3732_v11  ;;  %v560_v20 = vsel %vm4785_vm0, %v547_v12, 0.0 }
 0x1a6   : > { %v550_v22 = vmul.f32 %v3737_v15, %v3737_v15  ;;  %v562_v23 = vsel %vm4785_vm0, %v548_v16, 0.0  ;;  %v598_v37 = vmul.f32 0.125, %v597_v35  ;;  %v1264_v38 = vsel %vm4789_vm1, %v1211_v36, 0 }
 0x1a7   : > { %v555_v10 = vadd.f32 %v554_v9, %v553_v6  ;;  %v564_v25 = vsel %vm4785_vm0, %v549_v19, 0.0  ;;  %1273 = vmatpush.bf16.msrb.mxu0 %v1264_v38  ;;  %3199 = vmatpush.bf16.msra.mxu3 %v1264_v38  ;;  %v3761_v46 = vadd.s32 16, %v3755_v44  ;;  %v842_v57 = vmul.u32 14564, %v839_v47 }
 0x1a8   : > { %v566_v27 = vsel %vm4785_vm0, %v550_v22, 0.0  ;;  %v844_v63 = vmul.u32 14564, %v840_v51  ;;  %v846_v0 = vshll.u32 %v843_v52, 16  ;;  %v871_v1 = vmul.u32 14564, %v868_v48 }
 0x1a9   : > { %v557_v14 = vadd.f32 %v556_v13, %v555_v10  ;;  %v897_v55 = vand.u32 65535, %v3761_v46  ;;  %v873_v3 = vmul.u32 14564, %v869_v53  ;;  %v875_v4 = vshll.u32 %v872_v54, 16 }
 0x1aa   : > { %v845_v6 = vmul.u32 58254, %v840_v51  ;;  %v848_v8 = vshll.u32 %v844_v63, 16  ;;  %vm850_vm3 = vc.u32 %v842_v57, %v846_v0  ;;  %v852_v9 = vadd.s32 %v846_v0, %v842_v57 }
 0x1ab   : > { %v559_v18 = vadd.f32 %v558_v17, %v557_v14  ;;  %v874_v10 = vmul.u32 58254, %v869_v53  ;;  %v877_v12 = vshll.u32 %v873_v3, 16  ;;  %v3491_v14 = vmov 0  }
 0x1ac   : > { %v851_v16 = vsel %vm850_vm3, 1, %v3491_v14  ;;  %vm879_vm4 = vc.u32 %v871_v1, %v875_v4  ;;  %v881_v17 = vadd.s32 %v875_v4, %v871_v1  ;;  %vm854_vm6 = vc.u32 %v852_v9, %v848_v8  ;;  %1179 = vst.msk [vmem:[#allocation2] sm:$0xf] %vm4786_vm9, %v3491_v14 }
 0x1ad   : > { %v561_v21 = vadd.f32 %v560_v20, %v559_v18  ;;  %v853_v18 = vadd.s32 %v851_v16, %v845_v6  ;;  %v880_v19 = vsel %vm879_vm4, 1, %v3491_v14  ;;  %v855_v22 = vsel %vm854_vm6, 1, %v3491_v14  ;;  %1180 = vst.msk [vmem:[#allocation2 + $0x4] sm:$0xf] %vm4786_vm9, %v3491_v14 }
 0x1ae   : > { %vm883_vm8 = vc.u32 %v881_v17, %v877_v12  ;;  %v3784_v35 = vadd.s32 24, %v3755_v44  ;;  %v900_v43 = vmul.u32 14564, %v897_v55  ;;  %1181 = vst.msk [vmem:[#allocation2 + $0x2c] sm:$0xf] %vm4786_vm9, %v3491_v14 }
 0x1af   : > { %v563_v24 = vadd.f32 %v562_v23, %v561_v21  ;;  %v847_v21 = vshrl.u32 %v843_v52, 16  ;;  %v898_v23 = vshrl.u32 %v3761_v46, 16  ;;  %1182 = vst.msk [vmem:[#allocation2 + $0x30] sm:$0xf] %vm4786_vm9, %v3491_v14 }
 0x1b0   : > { %v926_v53 = vand.u32 65535, %v3784_v35 }
 0x1b1   : > { %v565_v26 = vadd.f32 %v564_v25, %v563_v24  ;;  %v857_v24 = vadd.s32 %v855_v22, %v853_v18  ;;  %v882_v25 = vadd.s32 %v880_v19, %v874_v10  ;;  %v3786_v36 = vmul.u32 14564, %v898_v23 }
 0x1b2   : > { %v927_v18 = vshrl.u32 %v3784_v35, 16 }
 0x1b3   : > { %v567_v28 = vadd.f32 %v566_v27, %v565_v26  ;;  %v876_v27 = vshrl.u32 %v872_v54, 16  ;;  %v906_v52 = vshll.u32 %v3786_v36, 16 }
 0x1b5   : > { %v568_v29 = vrot.slane %v567_v28, 4 }
 0x1b7   : > { %v569_v30 = vadd.f32 %v568_v29, %v567_v28  ;;  %v884_v28 = vsel %vm883_vm8, 1, %v3491_v14  ;;  %v3774_v29 = vmul.u32 58254, %v897_v55 }
 0x1b9   : > { %v570_v31 = vrot.slane %v569_v30, 2  ;;  %v904_v47 = vshll.u32 %v3774_v29, 16  ;;  %v905_v51 = vshrl.u32 %v3774_v29, 16 }
 0x1bb   : > { %v571_v32 = vadd.f32 %v570_v31, %v569_v30  ;;  %v3781_v31 = vld [vmem:[%s4772_s3] ss:$0 sm:$0xff]  ;;  %vm908_vm10 = vc.u32 %v900_v43, %v904_v47  ;;  %v910_v8 = vadd.s32 %v904_v47, %v900_v43  ;;  %v929_v43 = vmul.u32 14564, %v926_v53 }
 0x1bc   : > { %v909_v6 = vsel %vm908_vm10, 1, %v3491_v14 }
 0x1bd   : > { %v572_v33 = vrot.slane %v571_v32, 1  ;;  %vm912_vm11 = vc.u32 %v910_v8, %v906_v52 }
 0x1bf   : > { %v573_v34 = vadd.f32 %v572_v33, %v571_v32  ;;  %v849_v32 = vshrl.u32 %v844_v63, 16  ;;  %v858_v33 = vadd.s32 %v857_v24, %v847_v21  ;;  %v913_v21 = vsel %vm912_vm11, 1, %v3491_v14 }
 0x1c1   : > { %2906 = vmatmul.msk.f32.vlgmr.msra.gmra.mxu2 %vm4785_vm0, %v573_v34  ;;  %v886_v34 = vadd.s32 %v884_v28, %v882_v25 }
 0x244   : > { %v594_v39 = vpop.f32.mrf.mxu2 }
 0x245   : > { %v599_v40 = vsub.f32 %v594_v39, %v598_v37  ;;  %v3795_v39 = vld [vmem:[%s4773_s4] ss:$0 sm:$0xff] }
 0x247   : > { %v600_v41 = vmax.f32 %v599_v40, 0.0  ;;  %v878_v40 = vshrl.u32 %v873_v3, 16 }
 0x249   : > { %v601_v42 = vadd.f32 1e-05, %v600_v41 }
 0x24b   : > { %3271 = vrsqrt.f32 %v601_v42  ;;  %vm608_vm5 = vweird.f32 %v601_v42 }
 0x251   : > { %v3272_v49 = vpop.eup %3271 }
 0x252   : > { %v603_v50 = vmul.f32 %v3272_v49, %v601_v42  ;;  %vm609_vm2 = vweird.f32 %v3272_v49 }
 0x253   : > { %vm610_vm7 = vmor %vm608_vm5, %vm609_vm2 }
 0x254   : > { %v604_v56 = vmul.f32 %v3272_v49, %v603_v50  ;;  %v903_v50 = vmul.u32 58254, %v898_v23 }
 0x256   : > { %v605_v5 = vmul.f32 0.5, %v604_v56  ;;  %v911_v12 = vadd.s32 %v909_v6, %v903_v50 }
 0x258   : > { %v606_v13 = vsub.f32 1.5, %v605_v5  ;;  %v915_v24 = vadd.s32 %v913_v21, %v911_v12 }
 0x25a   : > { %v607_v20 = vmul.f32 %v3272_v49, %v606_v13 }
 0x25c   : > { %v611_v26 = vsel %vm610_vm7, %v3272_v49, %v607_v20  ;;  %v887_v49 = vadd.s32 %v886_v34, %v876_v27 }
 0x25d   : > { %v3776_v30 = vperm.slane %v611_v26, 0  ;;  %v3869_v26 = vmul.u32 58254, %v926_v53 }
 0x25e   : > { %v888_v55 = vadd.s32 %v887_v49, %v878_v40 }
 0x25f   : > { %v613_v37 = vmul.f32 %v3776_v30, %v3705_v58  ;;  %v614_v38 = vmul.f32 %v3776_v30, %v3707_v59  ;;  %v615_v41 = vmul.f32 %v3776_v30, %v3709_v60  ;;  %v616_v42 = vmul.f32 %v3776_v30, %v3711_v61 }
 0x260   : > { %v859_v59 = vadd.s32 %v858_v33, %v849_v32  ;;  %v889_v3 = vshrl.u32 %v888_v55, 3  ;;  %v617_v19 = vmul.f32 %v3776_v30, %v3713_v62  ;;  %v618_v20 = vmul.f32 %v3776_v30, %v3721_v2 }
 0x261   : > { %v625_v58 = vmul.f32 %v3781_v31, %v613_v37  ;;  %v626_v48 = vmul.f32 %v3781_v31, %v614_v38  ;;  %v627_v56 = vmul.f32 %v3781_v31, %v615_v41  ;;  %v628_v57 = vmul.f32 %v3781_v31, %v616_v42 }
 0x262   : > { %v860_v54 = vshrl.u32 %v859_v59, 3  ;;  %v890_v10 = vmul.u32 9, %v889_v3  ;;  %v620_v22 = vmul.f32 %v3776_v30, %v3732_v11  ;;  %v907_v11 = vshrl.u32 %v3786_v36, 16 }
 0x263   : > { %v3808_v60 = vadd.f32 %v3795_v39, %v625_v58  ;;  %v3811_v61 = vadd.f32 %v3795_v39, %v626_v48  ;;  %v3820_v4 = vadd.f32 %v3795_v39, %v627_v56  ;;  %v3823_v5 = vadd.f32 %v3795_v39, %v628_v57 }
 0x264   : > { %v861_v1 = vmul.u32 9, %v860_v54  ;;  %v3836_v17 = vsub.s32 %v3758_v45, %v890_v10  ;;  %v619_v45 = vmul.f32 %v3776_v30, %v3727_v7  ;;  %v3872_v28 = vmul.f32 %v3781_v31, %v617_v19  ;;  %v3162_v19 = vld [vmem:[#allocation2] sm:$0xf0] }
 0x265   : > { %v2907_v63 = vmul.f32 -1.442695, %v3808_v60  ;;  %v2908_v0 = vmul.f32 -1.442695, %v3811_v61  ;;  %v2909_v13 = vmul.f32 -1.442695, %v3820_v4  ;;  %v3875_v29 = vmul.f32 %v3781_v31, %v618_v20 }
 0x266   : > { %v3827_v9 = vsub.s32 %v3755_v44, %v861_v1  ;;  %v2910_v16 = vmul.f32 -1.442695, %v3823_v5  ;;  %vm1098_vm14 = vcmp.ne.s32.totalorder %v3836_v17, 0  ;;  %vm1107_vm15 = vcmp.lt.s32.totalorder %v3836_v17, 0 }
 0x267   : > { %3273 = vpow2.f32 %v2907_v63  ;;  %v3860_v2 = vadd.s32 9, %v3836_v17  ;;  %vm3862_vm3 = vmand %vm1107_vm15, %vm1098_vm14  ;;  %v3879_v33 = vmul.u32 14564, %v927_v18  ;;  %v3882_v34 = vmul.f32 %v3781_v31, %v619_v45 }
 0x268   : > { %3275 = vpow2.f32 %v2908_v0  ;;  %vm1097_vm12 = vcmp.ne.s32.totalorder %v3827_v9, 0  ;;  %vm1106_vm13 = vcmp.lt.s32.totalorder %v3827_v9, 0  ;;  %v1124_v62 = vadd.s32 9, %v3827_v9 }
 0x269   : > { %3277 = vpow2.f32 %v2909_v13  ;;  %vm3854_vm2 = vmand %vm1106_vm13, %vm1097_vm12  ;;  %v3885_v36 = vmul.f32 %v3781_v31, %v620_v22  ;;  %v916_v38 = vadd.s32 %v915_v24, %v905_v51  ;;  %v1134_v42 = vsel %vm3862_vm3, %v3860_v2, %v3836_v17 }
 0x26a   : > { %3279 = vpow2.f32 %v2910_v16  ;;  %v1133_v41 = vsel %vm3854_vm2, %v1124_v62, %v3827_v9  ;;  %v932_v58 = vmul.u32 58254, %v927_v18  ;;  %v933_v48 = vshll.u32 %v3869_v26, 16  ;;  %v2944_v18 = vld [vmem:[#allocation2] sm:$0x8] }
 0x26b   : > { %v934_v50 = vshrl.u32 %v3869_v26, 16  ;;  %v935_v51 = vshll.u32 %v3879_v33, 16  ;;  %v936_v52 = vshrl.u32 %v3879_v33, 16  ;;  %v917_v56 = vadd.s32 %v916_v38, %v907_v11 }
 0x26c   : > { %vm937_vm6 = vc.u32 %v929_v43, %v933_v48  ;;  %vm3934_vm11 = vcmp.lt.s32.totalorder %v1133_v41, 8  ;;  %vm3941_vm13 = vcmp.lt.s32.totalorder %v1134_v42, 8  ;;  %v3952_v41 = vadd.f32 %v3795_v39, %v3872_v28 }
 0x26d   : > { %v3274_v25 = vpop.eup %3273  ;;  %v918_v9 = vshrl.u32 %v917_v56, 3  ;;  %v938_v62 = vsel %vm937_vm6, 1, %v3491_v14 }
 0x26e   : > { %v3276_v27 = vpop.eup %3275  ;;  %v3877_v32 = vadd.f32 1.0, %v3274_v25  ;;  %v939_v25 = vadd.s32 %v933_v48, %v929_v43  ;;  %v940_v7 = vadd.s32 %v938_v62, %v932_v58 }
 0x26f   : > { %v3887_v37 = vadd.f32 1.0, %v3276_v27  ;;  %v3278_v40 = vpop.eup %3277  ;;  %v919_v23 = vmul.u32 9, %v918_v9 }
 0x270   : > { %3281 = vrcp.f32 %v3877_v32  ;;  %v693_v47 = vand.u32 2147483648, %v3877_v32  ;;  %v3280_v59 = vpop.eup %3279  ;;  %v3902_v49 = vadd.f32 1.0, %v3278_v40  ;;  %v691_v54 = vand.u32 2147483647, %v3877_v32 }
 0x271   : > { %3283 = vrcp.f32 %v3887_v37  ;;  %v708_v53 = vand.u32 2147483648, %v3887_v37  ;;  %v3909_v55 = vadd.f32 1.0, %v3280_v59  ;;  %vm687_vm4 = vweird.f32 %v3877_v32 }
 0x272   : > { %v706_v57 = vand.u32 2147483647, %v3887_v37  ;;  %3285 = vrcp.f32 %v3902_v49  ;;  %v723_v63 = vand.u32 2147483648, %v3902_v49  ;;  %v3915_v0 = vor.u32 1.1754944e-38, %v693_v47 }
 0x273   : > { %vm702_vm5 = vweird.f32 %v3887_v37  ;;  %3287 = vrcp.f32 %v3909_v55  ;;  %v738_v1 = vand.u32 2147483648, %v3909_v55  ;;  %v721_v6 = vand.u32 2147483647, %v3902_v49 }
 0x274   : > { %v736_v8 = vand.u32 2147483647, %v3909_v55  ;;  %vm3923_vm8 = vcmp.eq.f32.partialorder %v691_v54, 8.507059e+37  ;;  %v709_v16 = vor.u32 1.1754944e-38, %v708_v53  ;;  %v3927_v17 = vor.u32 1.1754944e-38, %v723_v63 }
 0x275   : > { %vm3930_vm10 = vcmp.eq.f32.partialorder %v706_v57, 8.507059e+37  ;;  %v3938_v22 = vor.u32 1.1754944e-38, %v738_v1  ;;  %v920_v38 = vsub.s32 %v3761_v46, %v919_v23  ;;  %v3948_v40 = vor.u32 %v3162_v19, %v2944_v18  ;;  %v2989_v54 = vld [vmem:[%s4774_s5 + $0xc] sm:$0xf]  ;;  %v2941_v19 = vld [vmem:[%s4774_s5 + $0x4] sm:$0xf] }
 0x276   : > { %v3282_v3 = vpop.eup %3281  ;;  %vm3955_vm3 = vcmp.eq.f32.partialorder %v721_v6, 8.507059e+37  ;;  %vm941_vm6 = vc.u32 %v939_v25, %v935_v51  ;;  %vm3960_vm9 = vcmp.eq.f32.partialorder %v736_v8, 8.507059e+37  ;;  %v4055_v51 = vadd.s32 32, %v3755_v44 }
 0x277   : > { %v3284_v10 = vpop.eup %3283  ;;  %v683_v12 = vmul.f32 %v3282_v3, %v3877_v32  ;;  %vm688_vm7 = vweird.f32 %v3282_v3  ;;  %v942_v28 = vsel %vm941_vm6, 1, %v3491_v14  ;;  %vm1099_vm0 = vcmp.ne.s32.totalorder %v920_v38, 0 }
 0x278   : > { %v698_v20 = vmul.f32 %v3284_v10, %v3887_v37  ;;  %vm703_vm12 = vweird.f32 %v3284_v10  ;;  %v3286_v11 = vpop.eup %3285  ;;  %vm3971_vm15 = vmor %vm687_vm4, %vm688_vm7  ;;  %v944_v57 = vadd.s32 %v942_v28, %v940_v7  ;;  %vm1108_vm14 = vcmp.lt.s32.totalorder %v920_v38, 0 }
 0x279   : > { %v684_v2 = vsub.f32 1.0, %v683_v12  ;;  %v3288_v42 = vpop.eup %3287  ;;  %v713_v59 = vmul.f32 %v3286_v11, %v3902_v49  ;;  %vm718_vm2 = vweird.f32 %v3286_v11  ;;  %vm3978_vm6 = vmor %vm702_vm5, %vm703_vm12  ;;  %v1126_v8 = vadd.s32 9, %v920_v38 }
 0x27a   : > { %v699_v27 = vsub.f32 1.0, %v698_v20  ;;  %v728_v48 = vmul.f32 %v3288_v42, %v3909_v55  ;;  %v945_v12 = vadd.s32 %v944_v57, %v934_v50  ;;  %vm3986_vm4 = vmand %vm1108_vm14, %vm1099_vm0  ;;  %v1677_v37 = vsel %vm4789_vm1, %v2989_v54, 0 }
 0x27b   : > { %v685_v47 = vmul.f32 %v3282_v3, %v684_v2  ;;  %v714_v56 = vsub.f32 1.0, %v713_v59  ;;  %v1135_v26 = vsel %vm3986_vm4, %v1126_v8, %v920_v38  ;;  %1686 = vmatpush.bf16.msrb.mxu3 %v1677_v37  ;;  %vm4828_vm0 = vweird.f32 %v3902_v49  ;;  %v3157_v59 = vld [vmem:[#allocation2] sm:$0xf0] }
 0x27c   : > { %v700_v58 = vmul.f32 %v3284_v10, %v699_v27  ;;  %v729_v6 = vsub.f32 1.0, %v728_v48  ;;  %v946_v25 = vadd.s32 %v945_v12, %v936_v52  ;;  %vm719_vm5 = vmor %vm4828_vm0, %vm718_vm2  ;;  %v4013_v7 = vadd.f32 %v3795_v39, %v3875_v29 }
 0x27d   : > { %v686_v53 = vadd.f32 %v3282_v3, %v685_v47  ;;  %v715_v9 = vmul.f32 %v3286_v11, %v714_v56  ;;  %vm4829_vm7 = vweird.f32 %v3288_v42  ;;  %vm4020_vm12 = vcmp.lt.s32.totalorder %v1135_v26, 8  ;;  %v2918_v47 = vld [vmem:[#allocation2] sm:$0x8] }
 0x27e   : > { %v701_v63 = vadd.f32 %v3284_v10, %v700_v58  ;;  %v730_v23 = vmul.f32 %v3288_v42, %v729_v6  ;;  %vm4833_vm14 = vcmask 60416   ;;  %v4037_v48 = vadd.f32 %v3795_v39, %v3882_v34 }
 0x27f   : > { %v690_v32 = vsel %vm3971_vm15, %v3282_v3, %v686_v53  ;;  %v716_v2 = vadd.f32 %v3286_v11, %v715_v9  ;;  %vm4834_vm15 = vmmov %vm4833_vm14  ;;  %v1350_v46 = vshll.u32 %v3948_v40, 16  ;;  %v2912_v34 = vmul.f32 -1.442695, %v4013_v7 }
 0x280   : > { %v695_v20 = vsel %vm3923_vm8, %v3915_v0, %v690_v32  ;;  %v705_v3 = vsel %vm3978_vm6, %v3284_v10, %v701_v63  ;;  %v731_v0 = vadd.f32 %v3288_v42, %v730_v23  ;;  %v1406_v10 = vsel %vm4789_vm1, %v2941_v19, 0  ;;  %vm4835_vm6 = vmmov %vm4833_vm14 }
 0x281   : > { %v710_v50 = vsel %vm3930_vm10, %v709_v16, %v705_v3  ;;  %v817_v62 = vmul.f32 %v695_v20, %v3808_v60  ;;  %v720_v16 = vsel %vm719_vm5, %v3286_v11, %v716_v2  ;;  %vm4830_vm8 = vweird.f32 %v3909_v55  ;;  %1415 = vmatpush.bf16.msrb.mxu1 %v1406_v10  ;;  %3200 = vmatpush.bf16.msrb.mxu2 %v1406_v10  ;;  %vm4838_vm5 = vmmov %vm4835_vm6 }
 0x282   : > { %v818_v13 = vmul.f32 %v710_v50, %v3811_v61  ;;  %vm734_vm10 = vmor %vm4830_vm8, %vm4829_vm7  ;;  %v947_v61 = vshrl.u32 %v946_v25, 3  ;;  %v725_v52 = vsel %vm3955_vm3, %v3927_v17, %v720_v16  ;;  %v1352_v63 = vrot.slane %v1350_v46, 4 }
 0x283   : > { %v1169_v60 = vsel %vm3934_vm11, %v817_v62, 0.0  ;;  %v735_v21 = vsel %vm734_vm10, %v3288_v42, %v731_v0  ;;  %v819_v27 = vmul.f32 %v725_v52, %v3820_v4  ;;  %v4045_v4 = vadd.f32 %v3795_v39, %v3885_v36 }
 0x284   : > { %v1170_v49 = vsel %vm3941_vm13, %v818_v13, 0.0  ;;  %v1183_v29 = vpack.c.bf16 %v1169_v60, %v1169_v60  ;;  %v740_v55 = vsel %vm3960_vm9, %v3938_v22, %v735_v21  ;;  %v948_v38 = vmul.u32 9, %v947_v61 }
 0x285   : > { %v1184_v11 = vpack.c.bf16 %v1170_v49, %v1170_v49  ;;  %v820_v58 = vmul.f32 %v740_v55, %v3823_v5  ;;  %v1171_v22 = vsel %vm4020_vm12, %v819_v27, 0.0  ;;  %v2911_v42 = vmul.f32 -1.442695, %v3952_v41 }
 0x286   : > { %1192 = vst.msk [vmem:[#allocation2 + $0x8] sm:$0xf] %vm4833_vm14, %v1183_v29  ;;  %v949_v17 = vsub.s32 %v3784_v35, %v948_v38  ;;  %v1185_v43 = vpack.c.bf16 %v1171_v22, %v1171_v22  ;;  %v1347_v5 = vshrl.u32 %v3948_v40, 16  ;;  %v2919_v35 = vor.u32 %v3157_v59, %v2918_v47 }
 0x287   : > { %1193 = vst.msk [vmem:[#allocation2 + $0xc] sm:$0xf] %vm4834_vm15, %v1184_v11  ;;  %3289 = vpow2.f32 %v2911_v42  ;;  %v2913_v36 = vmul.f32 -1.442695, %v4037_v48  ;;  %v2914_v54 = vmul.f32 -1.442695, %v4045_v4 }
 0x288   : > { %vm1100_vm9 = vcmp.ne.s32.totalorder %v949_v17, 0  ;;  %vm1109_vm2 = vcmp.lt.s32.totalorder %v949_v17, 0  ;;  %v1127_v28 = vadd.s32 9, %v949_v17  ;;  %1194 = vst.msk [vmem:[#allocation2 + $0x10] sm:$0xf] %vm4835_vm6, %v1185_v43  ;;  %3291 = vpow2.f32 %v2912_v34 }
 0x289   : > { %vm1118_vm3 = vmand %vm1109_vm2, %vm1100_vm9  ;;  %v1349_v56 = vrot.slane %v1347_v5, 3  ;;  %3293 = vpow2.f32 %v2913_v36  ;;  %v955_v1 = vand.u32 65535, %v4055_v51  ;;  %v1238_v8 = vrot.slane %v2919_v35, 3 }
 0x28a   : > { %v1136_v53 = vsel %vm1118_vm3, %v1127_v28, %v949_v17  ;;  %3295 = vpow2.f32 %v2914_v54  ;;  %vm4787_vm0 = vcmask 1044480   ;;  %v956_v50 = vshrl.u32 %v4055_v51, 16 }
 0x28b   : > { %vm4057_vm4 = vcmp.lt.s32.totalorder %v1136_v53, 8  ;;  %v1353_v23 = vor.u32 %v1352_v63, %v1349_v56  ;;  %v4070_v62 = vmul.u32 58254, %v955_v1  ;;  %vm4839_vm7 = vcmask 64512  }
 0x28c   : > { %v1172_v57 = vsel %vm4057_vm4, %v820_v58, 0.0  ;;  %vm4788_vm8 = vsmask.f32 4352  ;;  %v4078_v16 = vadd.s32 40, %v3755_v44  ;;  %v4086_v29 = vadd.s32 48, %v3755_v44  ;;  %vm4840_vm10 = vmmov %vm4839_vm7 }
 0x28d   : > { %v1186_v32 = vpack.c.bf16 %v1172_v57, %v1172_v57  ;;  %v3290_v12 = vpop.eup %3289  ;;  %v958_v52 = vmul.u32 14564, %v955_v1  ;;  %v4088_v21 = vmul.u32 14564, %v956_v50  ;;  %v962_v11 = vshll.u32 %v4070_v62, 16  ;;  %vm4843_vm3 = vmmov %vm4839_vm7 }
 0x28e   : > { %v3158_v6 = vld [vmem:[#allocation2 + $0x8] sm:$0xff]  ;;  %v3292_v18 = vpop.eup %3291  ;;  %v4065_v3 = vadd.f32 1.0, %v3290_v12  ;;  %v4101_v59 = vadd.s32 56, %v3755_v44  ;;  %v984_v58 = vand.u32 65535, %v4078_v16  ;;  %v4106_v17 = vmul.f32 %v3776_v30, %v3737_v15 }
 0x28f   : > { %v3163_v9 = vld [vmem:[#allocation2 + $0x8] sm:$0xff]  ;;  %v1239_v37 = vrot.slane %v3158_v6, 3  ;;  %1195 = vst.msk [vmem:[#allocation2 + $0x14] sm:$0xf] %vm4838_vm5, %v1186_v32  ;;  %v4067_v26 = vadd.f32 1.0, %v3292_v18  ;;  %v3294_v2 = vpop.eup %3293  ;;  %v961_v42 = vmul.u32 58254, %v956_v50  ;;  %vm966_vm2 = vc.u32 %v958_v52, %v962_v11 }
 0x290   : > { %v1355_v19 = vshrl.u32 %v3163_v9, 16  ;;  %v1358_v20 = vshll.u32 %v3163_v9, 16  ;;  %3297 = vrcp.f32 %v4065_v3  ;;  %v3296_v10 = vpop.eup %3295  ;;  %v4075_v60 = vadd.f32 1.0, %v3294_v2 }
 0x291   : > { %v1240_v25 = vsel %vm4787_vm0, %v1238_v8, %v1239_v37  ;;  %v4082_v49 = vadd.f32 1.0, %v3296_v10  ;;  %3299 = vrcp.f32 %v4067_v26  ;;  %v751_v27 = vand.u32 2147483647, %v4065_v3 }
 0x292   : > { %v1357_v13 = vrot.slane %v1355_v19, 3  ;;  %v1360_v0 = vrot.slane %v1358_v20, 4  ;;  %2936 = vmatmul.msk.bf16.vlgmr.msrb.gmra.mxu0 %vm4839_vm7, %v1240_v25  ;;  %v753_v38 = vand.u32 2147483648, %v4065_v3  ;;  %3301 = vrcp.f32 %v4075_v60 }
 0x293   : > { %3303 = vrcp.f32 %v4082_v49  ;;  %v963_v43 = vshrl.u32 %v4070_v62, 16  ;;  %v985_v5 = vshrl.u32 %v4078_v16, 16  ;;  %v1013_v46 = vand.u32 65535, %v4086_v29 }
 0x294   : > { %v4080_v61 = vor.u32 %v1360_v0, %v1357_v13  ;;  %vm747_vm14 = vweird.f32 %v4065_v3  ;;  %v964_v35 = vshll.u32 %v4088_v21, 16  ;;  %vm4115_vm15 = vcmp.eq.f32.partialorder %v751_v27, 8.507059e+37 }
 0x295   : > { %v754_v30 = vor.u32 1.1754944e-38, %v753_v38  ;;  %vm762_vm9 = vweird.f32 %v4067_v26  ;;  %v766_v54 = vand.u32 2147483647, %v4067_v26  ;;  %v768_v63 = vand.u32 2147483648, %v4067_v26 }
 0x296   : > { %v1362_v55 = vsel %vm4788_vm8, %v1353_v23, %v4080_v61  ;;  %v4096_v47 = vld [vmem:[#allocation2 + $0x10] sm:$0xff]  ;;  %v3298_v22 = vpop.eup %3297  ;;  %v781_v6 = vand.u32 2147483647, %v4075_v60  ;;  %v967_v8 = vsel %vm966_vm2, 1, %v3491_v14  ;;  %v968_v32 = vadd.s32 %v962_v11, %v958_v52 }
 0x297   : > { %2962 = vmatmul.msk.bf16.vlgmr.msrb.gmra.mxu1 %vm4840_vm10, %v1362_v55  ;;  %v1241_v34 = vrot.slane %v4096_v47, 3  ;;  %v743_v28 = vmul.f32 %v3298_v22, %v4065_v3  ;;  %v3300_v36 = vpop.eup %3299  ;;  %vm748_vm6 = vweird.f32 %v3298_v22  ;;  %v988_v19 = vmul.u32 58254, %v984_v58 }
 0x298   : > { %v758_v57 = vmul.f32 %v3300_v36, %v4067_v26  ;;  %v4126_v1 = vpop.eup %3301  ;;  %v965_v23 = vshrl.u32 %v4088_v21, 16  ;;  %v969_v50 = vadd.s32 %v967_v8, %v961_v42  ;;  %vm970_vm5 = vc.u32 %v968_v32, %v964_v35  ;;  %vm749_vm7 = vmor %vm747_vm14, %vm748_vm6 }
 0x299   : > { %v1242_v53 = vsel %vm4787_vm0, %v1239_v37, %v1241_v34  ;;  %v744_v56 = vsub.f32 1.0, %v743_v28  ;;  %v4131_v9 = vpop.eup %3303  ;;  %v773_v37 = vmul.f32 %v4126_v1, %v4075_v60  ;;  %v971_v13 = vsel %vm970_vm5, 1, %v3491_v14 }
 0x29a   : > { %2937 = vmatmul.msk.bf16.vlgmr.msra.gmra.mxu3 %vm4843_vm3, %v1242_v53  ;;  %v759_v18 = vsub.f32 1.0, %v758_v57  ;;  %v788_v20 = vmul.f32 %v4131_v9, %v4082_v49  ;;  %vm763_vm10 = vweird.f32 %v3300_v36  ;;  %v973_v10 = vadd.s32 %v971_v13, %v969_v50 }
 0x29b   : > { %v745_v12 = vmul.f32 %v3298_v22, %v744_v56  ;;  %v774_v25 = vsub.f32 1.0, %v773_v37  ;;  %v989_v52 = vmul.u32 14564, %v985_v5  ;;  %v987_v27 = vmul.u32 14564, %v984_v58  ;;  %vm4151_vm14 = vmor %vm762_vm9, %vm763_vm10 }
 0x29c   : > { %v760_v2 = vmul.f32 %v3300_v36, %v759_v18  ;;  %v789_v0 = vsub.f32 1.0, %v788_v20  ;;  %v991_v38 = vshll.u32 %v988_v19, 16  ;;  %vm4142_vm2 = vcmp.eq.f32.partialorder %v766_v54, 8.507059e+37 }
 0x29d   : > { %v746_v62 = vadd.f32 %v3298_v22, %v745_v12  ;;  %v769_v42 = vor.u32 1.1754944e-38, %v768_v63  ;;  %v775_v28 = vmul.f32 %v4126_v1, %v774_v25  ;;  %v974_v35 = vadd.s32 %v973_v10, %v963_v43 }
 0x29e   : > { %v761_v55 = vadd.f32 %v3300_v36, %v760_v2  ;;  %v790_v58 = vmul.f32 %v4131_v9, %v789_v0  ;;  %v993_v54 = vshll.u32 %v989_v52, 16  ;;  %v783_v57 = vand.u32 2147483648, %v4075_v60 }
 0x29f   : > { %v750_v11 = vsel %vm749_vm7, %v3298_v22, %v746_v62  ;;  %v990_v22 = vmul.u32 58254, %v985_v5  ;;  %v796_v43 = vand.u32 2147483647, %v4082_v49  ;;  %v975_v63 = vadd.s32 %v974_v35, %v965_v23 }
 0x2a0   : > { %v755_v3 = vsel %vm4115_vm15, %v754_v30, %v750_v11  ;;  %v765_v56 = vsel %vm4151_vm14, %v3300_v36, %v761_v55  ;;  %v798_v15 = vand.u32 2147483648, %v4082_v49  ;;  %v992_v30 = vshrl.u32 %v988_v19, 16 }
 0x2a1   : > { %vm995_vm15 = vc.u32 %v987_v27, %v991_v38  ;;  %v997_v26 = vadd.s32 %v991_v38, %v987_v27  ;;  %v4162_v8 = vadd.f32 %v4126_v1, %v775_v28  ;;  %v4165_v32 = vmul.f32 %v755_v3, %v3952_v41 }
 0x2a2   : > { %v976_v5 = vshrl.u32 %v975_v63, 3  ;;  %v996_v12 = vsel %vm995_vm15, 1, %v3491_v14  ;;  %v770_v36 = vsel %vm4142_vm2, %v769_v42, %v765_v56  ;;  %v4171_v18 = vadd.f32 %v4131_v9, %v790_v58 }
 0x2a3   : > { %v998_v37 = vadd.s32 %v996_v12, %v990_v22  ;;  %vm999_vm9 = vc.u32 %v997_v26, %v993_v54  ;;  %v994_v20 = vshrl.u32 %v989_v52, 16  ;;  %v1014_v50 = vshrl.u32 %v4086_v29, 16  ;;  %v3164_v54 = vld [vmem:[#allocation2 + $0x10] sm:$0xff] }
 0x2a4   : > { %v977_v19 = vmul.u32 9, %v976_v5  ;;  %v1000_v23 = vsel %vm999_vm9, 1, %v3491_v14  ;;  %v1016_v41 = vmul.u32 14564, %v1013_v46  ;;  %v1017_v2 = vmul.u32 58254, %v1013_v46 }
 0x2a5   : > { %v1002_v62 = vadd.s32 %v1000_v23, %v998_v37  ;;  %v1042_v25 = vand.u32 65535, %v4101_v59  ;;  %vm778_vm3 = vweird.f32 %v4126_v1  ;;  %v4182_v13 = vmul.f32 %v770_v36, %v4013_v7 }
 0x2a6   : > { %v978_v0 = vsub.s32 %v4055_v51, %v977_v19  ;;  %v1018_v10 = vmul.u32 14564, %v1014_v50  ;;  %v1043_v52 = vshrl.u32 %v4101_v59, 16  ;;  %v1019_v55 = vmul.u32 58254, %v1014_v50 }
 0x2a7   : > { %v1003_v11 = vadd.s32 %v1002_v62, %v992_v30  ;;  %v1020_v27 = vshll.u32 %v1017_v2, 16  ;;  %v1021_v38 = vshrl.u32 %v1017_v2, 16  ;;  %vm777_vm6 = vweird.f32 %v4075_v60  ;;  %v3063_v60 = vld [vmem:[%s4774_s5 + $0x18] sm:$0xf] }
 0x2a8   : > { %v1022_v21 = vshll.u32 %v1018_v10, 16  ;;  %v1045_v46 = vmul.u32 14564, %v1042_v25  ;;  %v1046_v42 = vmul.u32 58254, %v1042_v25  ;;  %v1047_v28 = vmul.u32 14564, %v1043_v52 }
 0x2a9   : > { %vm793_vm5 = vweird.f32 %v4131_v9  ;;  %v1004_v35 = vadd.s32 %v1003_v11, %v994_v20  ;;  %v1023_v7 = vshrl.u32 %v1018_v10, 16  ;;  %vm1024_vm7 = vc.u32 %v1016_v41, %v1020_v27 }
 0x2aa   : > { %v1026_v3 = vadd.s32 %v1020_v27, %v1016_v41  ;;  %v1025_v51 = vsel %vm1024_vm7, 1, %v3491_v14  ;;  %v1048_v53 = vmul.u32 58254, %v1043_v52  ;;  %v1049_v58 = vshll.u32 %v1046_v42, 16 }
 0x2ab   : > { %v1051_v22 = vshll.u32 %v1047_v28, 16  ;;  %vm792_vm10 = vweird.f32 %v4082_v49  ;;  %v1005_v56 = vshrl.u32 %v1004_v35, 3  ;;  %v1027_v63 = vadd.s32 %v1025_v51, %v1019_v55 }
 0x2ac   : > { %vm1028_vm2 = vc.u32 %v1026_v3, %v1022_v21  ;;  %v1050_v30 = vshrl.u32 %v1046_v42, 16  ;;  %vm1053_vm14 = vc.u32 %v1045_v46, %v1049_v58  ;;  %v1055_v5 = vadd.s32 %v1049_v58, %v1045_v46 }
 0x2ad   : > { %v1029_v26 = vsel %vm1028_vm2, 1, %v3491_v14  ;;  %vm1101_vm15 = vcmp.ne.s32.totalorder %v978_v0, 0  ;;  %vm4193_vm9 = vcmp.eq.f32.partialorder %v781_v6, 8.507059e+37  ;;  %v1006_v36 = vmul.u32 9, %v1005_v56  ;;  %vm4210_vm2 = vmor %vm777_vm6, %vm778_vm3 }
 0x2ae   : > { %v1031_v37 = vadd.s32 %v1029_v26, %v1027_v63  ;;  %v1054_v19 = vsel %vm1053_vm14, 1, %v3491_v14  ;;  %vm1110_vm7 = vcmp.lt.s32.totalorder %v978_v0, 0  ;;  %vm1057_vm0 = vc.u32 %v1055_v5, %v1051_v22  ;;  %v3185_v5 = vld [vmem:[#allocation2 + $0xc] sm:$0xff] }
 0x2af   : > { %v1056_v20 = vadd.s32 %v1054_v19, %v1048_v53  ;;  %vm4198_vm8 = vmand %vm1110_vm7, %vm1101_vm15  ;;  %v1128_v50 = vadd.s32 9, %v978_v0  ;;  %v1364_v62 = vshrl.u32 %v3164_v54, 16  ;;  %v1007_v41 = vsub.s32 %v4078_v16, %v1006_v36 }
 0x2b0   : > { %v1032_v2 = vadd.s32 %v1031_v37, %v1021_v38  ;;  %v1058_v6 = vsel %vm1057_vm0, 1, %v3491_v14  ;;  %v1367_v25 = vshll.u32 %v3164_v54, 16  ;;  %v1052_v10 = vshrl.u32 %v1047_v28, 16 }
 0x2b1   : > { %v1060_v52 = vadd.s32 %v1058_v6, %v1056_v20  ;;  %v1137_v11 = vsel %vm4198_vm8, %v1128_v50, %v978_v0  ;;  %v1366_v55 = vrot.slane %v1364_v62, 3  ;;  %vm1102_vm14 = vcmp.ne.s32.totalorder %v1007_v41, 0  ;;  %vm4234_vm8 = vmor %vm792_vm10, %vm793_vm5 }
 0x2b2   : > { %v1033_v21 = vadd.s32 %v1032_v2, %v1023_v7  ;;  %vm1111_vm15 = vcmp.lt.s32.totalorder %v1007_v41, 0  ;;  %v1129_v16 = vadd.s32 9, %v1007_v41  ;;  %v784_v38 = vor.u32 1.1754944e-38, %v783_v57 }
 0x2b3   : > { %v1061_v46 = vadd.s32 %v1060_v52, %v1050_v30  ;;  %vm1120_vm0 = vmand %vm1111_vm15, %vm1102_vm14  ;;  %vm4216_vm7 = vcmp.lt.s32.totalorder %v1137_v11, 8  ;;  %v1369_v42 = vrot.slane %v1367_v25, 4  ;;  %v780_v28 = vsel %vm4210_vm2, %v4126_v1, %v4162_v8 }
 0x2b4   : > { %v1034_v35 = vshrl.u32 %v1033_v21, 3  ;;  %v1138_v7 = vsel %vm1120_vm0, %v1129_v16, %v1007_v41  ;;  %v1173_v3 = vsel %vm4216_vm7, %v4165_v32, 0.0  ;;  %v4858_v1 = vmov 0 }
 0x2b5   : > { %v1062_v51 = vadd.s32 %v1061_v46, %v1052_v10  ;;  %vm4238_vm3 = vcmp.lt.s32.totalorder %v1138_v7, 8  ;;  %v1187_v8 = vpack.c.bf16 %v1173_v3, %v1173_v3  ;;  %v2056_v32 = vsel %vm4789_vm1, %v3063_v60, 0  ;;  %v2967_v3 = vld [vmem:[%s4774_s5 + $0x8] sm:$0xf] }
 0x2b6   : > { %v4859_v1 = vsel %vm4238_vm3, 4294967295, %v4858_v1  ;;  %v795_v53 = vsel %vm4234_vm8, %v4131_v9, %v4171_v18  ;;  %v1035_v58 = vmul.u32 9, %v1034_v35  ;;  %v1174_v22 = vsel %vm4238_vm3, %v4182_v13, 0.0  ;;  %2065 = vmatpush.bf16.msra.mxu0 %v2056_v32  ;;  %v3015_v35 = vld [vmem:[%s4774_s5 + $0x10] sm:$0xf] }
 0x2b7   : > { %v4250_v54 = vor.u32 %v1369_v42, %v1366_v55  ;;  %v785_v56 = vsel %vm4193_vm9, %v784_v38, %v780_v28  ;;  %v799_v63 = vor.u32 1.1754944e-38, %v798_v15  ;;  %v1063_v30 = vshrl.u32 %v1062_v51, 3 }
 0x2b8   : > { %v1188_v26 = vpack.c.bf16 %v1174_v22, %v1174_v22  ;;  %vm4860_vm6 = vcmask 60416   ;;  %vm797_vm5 = vcmp.eq.f32.partialorder %v796_v43, 8.507059e+37  ;;  %v1036_v9 = vsub.s32 %v4086_v29, %v1035_v58 }
 0x2b9   : > { %1196 = vst.msk [vmem:[#allocation2 + $0x18] sm:$0xf] %vm4860_vm6, %v1187_v8  ;;  %vm4861_vm10 = vsmask.f32 4352  ;;  %v633_v13 = vmul.f32 %v3781_v31, %v4106_v17  ;;  %v800_v12 = vsel %vm797_vm5, %v799_v63, %v795_v53  ;;  %v1064_v36 = vmul.u32 9, %v1063_v30  ;;  %vm4862_vm9 = vmmov %vm4860_vm6 }
 0x2ba   : > { %v1371_v18 = vsel %vm4861_vm10, %v4080_v61, %v4250_v54  ;;  %1197 = vst.msk [vmem:[#allocation2 + $0x1c] sm:$0xf] %vm4862_vm9, %v1188_v26  ;;  %vm4863_vm2 = vcmask 64512   ;;  %v4269_v49 = vadd.s32 64, %v3755_v44  ;;  %v823_v29 = vmul.f32 %v785_v56, %v4037_v48 }
 0x2bb   : > { %3080 = vmatmul.msk.bf16.vlgmr.msra.gmra.mxu0 %vm4863_vm2, %v3185_v5  ;;  %vm4864_vm14 = vmmov %vm4863_vm2  ;;  %vm1103_vm15 = vcmp.ne.s32.totalorder %v1036_v9, 0  ;;  %vm1112_vm0 = vcmp.lt.s32.totalorder %v1036_v9, 0  ;;  %v1130_v43 = vadd.s32 9, %v1036_v9  ;;  %v1065_v61 = vsub.s32 %v4101_v59, %v1064_v36 }
 0x2bc   : > { %2963 = vmatmul.msk.bf16.gmra.mxu1 %vm4864_vm14, %v1371_v18  ;;  %vm1121_vm8 = vmand %vm1112_vm0, %vm1103_vm15  ;;  %v4274_v31 = vadd.f32 %v3795_v39, %v633_v13  ;;  %v1071_v17 = vand.u32 65535, %v4269_v49  ;;  %v1072_v15 = vshrl.u32 %v4269_v49, 16  ;;  %v824_v37 = vmul.f32 %v800_v12, %v4045_v4 }
 0x2bd   : > { %v1139_v19 = vsel %vm1121_vm8, %v1130_v43, %v1036_v9  ;;  %vm1104_vm6 = vcmp.ne.s32.totalorder %v1065_v61, 0  ;;  %vm1113_vm5 = vcmp.lt.s32.totalorder %v1065_v61, 0  ;;  %v1131_v44 = vadd.s32 9, %v1065_v61 }
 0x2be   : > { %vm4279_vm10 = vcmp.lt.s32.totalorder %v1139_v19, 8  ;;  %v4865_v48 = vmov 0  ;;  %vm1122_vm9 = vmand %vm1113_vm5, %vm1104_vm6  ;;  %v2915_v39 = vmul.f32 -1.442695, %v4274_v31  ;;  %v1074_v20 = vmul.u32 14564, %v1071_v17 }
 0x2bf   : > { %v4866_v48 = vsel %vm4279_vm10, 4294967295, %v4865_v48  ;;  %v1175_v59 = vsel %vm4279_vm10, %v823_v29, 0.0  ;;  %v1140_v23 = vsel %vm1122_vm9, %v1131_v44, %v1065_v61  ;;  %v1075_v62 = vmul.u32 58254, %v1071_v17 }
 0x2c0   : > { %v1189_v50 = vpack.c.bf16 %v1175_v59, %v1175_v59  ;;  %v1076_v41 = vmul.u32 14564, %v1072_v15  ;;  %vm4286_vm2 = vcmp.lt.s32.totalorder %v1140_v23, 8  ;;  %v4867_v4 = vmov 0  ;;  %v3186_v53 = vld [vmem:[#allocation2 + $0x14] sm:$0xff] }
 0x2c1   : > { %v4868_v4 = vsel %vm4286_vm2, 4294967295, %v4867_v4  ;;  %v3165_v2 = vld [vmem:[#allocation2 + $0x18] sm:$0xff]  ;;  %3305 = vpow2.f32 %v2915_v39  ;;  %v1176_v25 = vsel %vm4286_vm2, %v824_v37, 0.0  ;;  %vm4869_vm14 = vcmask 60416  }
 0x2c2   : > { %v3160_v6 = vld [vmem:[#allocation2 + $0x18] sm:$0xff]  ;;  %1198 = vst.msk [vmem:[#allocation2 + $0x20] sm:$0xf] %vm4869_vm14, %v1189_v50  ;;  %v1077_v10 = vmul.u32 58254, %v1072_v15  ;;  %v1078_v52 = vshll.u32 %v1075_v62, 16  ;;  %v1080_v11 = vshll.u32 %v1076_v41, 16  ;;  %v1190_v55 = vpack.c.bf16 %v1176_v25, %v1176_v25  ;;  %vm4870_vm0 = vmmov %vm4869_vm14 }
 0x2c3   : > { %v1373_v27 = vshrl.u32 %v3165_v2, 16  ;;  %v1376_v21 = vshll.u32 %v3165_v2, 16  ;;  %v1243_v16 = vrot.slane %v3160_v6, 3  ;;  %vm4871_vm8 = vcmask 1044480  }
 0x2c4   : > { %vm1082_vm15 = vc.u32 %v1074_v20, %v1078_v52  ;;  %v1084_v38 = vadd.s32 %v1078_v52, %v1074_v20  ;;  %1199 = vst.msk [vmem:[#allocation2 + $0x24] sm:$0xf] %vm4870_vm0, %v1190_v55  ;;  %vm4872_vm6 = vcmask 64512   ;;  %v1789_v7 = vsel %vm4789_vm1, %v3015_v35, 0 }
 0x2c5   : > { %v1375_v46 = vrot.slane %v1373_v27, 3  ;;  %v1378_v42 = vrot.slane %v1376_v21, 4  ;;  %v1244_v28 = vsel %vm4871_vm8, %v1241_v34, %v1243_v16  ;;  %v1079_v60 = vshrl.u32 %v1075_v62, 16  ;;  %1798 = vmatpush.bf16.msra.mxu1 %v1789_v7  ;;  %vm4874_vm14 = vmmov %vm4872_vm6 }
 0x2c6   : > { %2938 = vmatmul.msk.bf16.gmra.mxu3 %vm4872_vm6, %v1244_v28  ;;  %v1083_v57 = vsel %vm1082_vm15, 1, %v3491_v14  ;;  %vm1086_vm5 = vc.u32 %v1084_v38, %v1080_v11  ;;  %v1518_v34 = vsel %vm4789_vm1, %v2967_v3, 0  ;;  %vm4873_vm9 = vsmask.f32 4352  ;;  %vm4875_vm15 = vmmov %vm4872_vm6  ;;  %v3171_v38 = vld [vmem:[#allocation2 + $0x4] sm:$0xf0] }
 0x2c7   : > { %v3306_v51 = vpop.eup %3305  ;;  %v1379_v47 = vor.u32 %v1378_v42, %v1375_v46  ;;  %v1085_v8 = vadd.s32 %v1083_v57, %v1077_v10  ;;  %v1087_v32 = vsel %vm1086_vm5, 1, %v3491_v14  ;;  %1527 = vmatpush.bf16.msra.mxu2 %v1518_v34  ;;  %v1081_v56 = vshrl.u32 %v1076_v41, 16  ;;  %vm4876_vm0 = vmmov %vm4873_vm9  ;;  %v3037_v46 = vld [vmem:[%s4774_s5 + $0x14] sm:$0xf]  ;;  %v3172_v42 = vld [vmem:[#allocation2 + $0xc] sm:$0xff] }
 0x2c8   : > { %v681_v58 = vadd.f32 1.0, %v3306_v51  ;;  %vm4877_vm5 = vmmov %vm4874_vm14  ;;  %v1629_v34 = vshll.u32 %v3172_v42, 16 }
 0x2c9   : > { %v1380_v22 = vsel %vm4873_vm9, %v4250_v54, %v1379_v47  ;;  %v1089_v63 = vadd.s32 %v1087_v32, %v1085_v8  ;;  %v2934_v30 = vld [vmem:[#allocation2 + $0x20] sm:$0xf]  ;;  %vm4880_vm3 = vmmov %vm4877_vm5 }
 0x2ca   : > { %3307 = vrcp.f32 %v681_v58  ;;  %v811_v44 = vand.u32 2147483647, %v681_v58  ;;  %v813_v23 = vand.u32 2147483648, %v681_v58  ;;  %vm807_vm2 = vweird.f32 %v681_v58  ;;  %v3187_v6 = vld [vmem:[#allocation2 + $0x1c] sm:$0xff] }
 0x2cb   : > { %3081 = vmatmul.msk.bf16.gmra.mxu0 %vm4874_vm14, %v3186_v53  ;;  %v1090_v26 = vadd.s32 %v1089_v63, %v1079_v60  ;;  %v3166_v5 = vld [vmem:[#allocation2 + $0x20] sm:$0xff]  ;;  %v3177_v60 = vld [vmem:[#allocation2 + $0x10] sm:$0xff] }
 0x2cc   : > { %2964 = vmatmul.msk.bf16.gmra.mxu1 %vm4875_vm15, %v1380_v22  ;;  %v3161_v9 = vld [vmem:[#allocation2 + $0x20] sm:$0x70]  ;;  %v1382_v14 = vshrl.u32 %v3166_v5, 16  ;;  %v1385_v12 = vshll.u32 %v3166_v5, 16  ;;  %vm4878_vm15 = vmmov %vm4877_vm5  ;;  %v814_v25 = vor.u32 1.1754944e-38, %v813_v23  ;;  %v3173_v5 = vld [vmem:[#allocation2 + $0x14] sm:$0xff] }
 0x2cd   : > { %v2935_v18 = vor.u32 %v3161_v9, %v2934_v30  ;;  %v1091_v13 = vadd.s32 %v1090_v26, %v1081_v56  ;;  %v3167_v63 = vld [vmem:[#allocation2 + $0x4] sm:$0xff]  ;;  %v3111_v26 = vld [vmem:[%s4774_s5 + $0x20] sm:$0xf] }
 0x2ce   : > { %v1384_v43 = vrot.slane %v1382_v14, 3  ;;  %v1387_v61 = vrot.slane %v1385_v12, 4  ;;  %v1638_v14 = vshll.u32 %v3173_v5, 16 }
 0x2cf   : > { %v1092_v36 = vshrl.u32 %v1091_v13, 3  ;;  %v1245_v54 = vrot.slane %v2935_v18, 3  ;;  %v3178_v18 = vld [vmem:[#allocation2 + $0x18] sm:$0xff]  ;;  %v1635_v13 = vshrl.u32 %v3173_v5, 16 }
 0x2d0   : > { %v3308_v29 = vpop.eup %3307  ;;  %v1388_v37 = vor.u32 %v1387_v61, %v1384_v43  ;;  %v3168_v43 = vld [vmem:[#allocation2 + $0xc] sm:$0xff] }
 0x2d1   : > { %v803_v17 = vmul.f32 %v3308_v29, %v681_v58  ;;  %v1093_v15 = vmul.u32 9, %v1092_v36  ;;  %v1246_v20 = vsel %vm4871_vm8, %v1243_v16, %v1245_v54  ;;  %vm808_vm6 = vweird.f32 %v3308_v29  ;;  %vm4879_vm8 = vmmov %vm4877_vm5  ;;  %v2992_v16 = vld [vmem:[#allocation2 + $0x4] sm:$0x8] }
 0x2d2   : > { %v1389_v39 = vsel %vm4876_vm0, %v1379_v47, %v1388_v37  ;;  %vm809_vm10 = vmor %vm807_vm2, %vm808_vm6  ;;  %vm812_vm0 = vcmp.eq.f32.partialorder %v811_v44, 8.507059e+37  ;;  %v2993_v28 = vor.u32 %v3171_v38, %v2992_v16  ;;  %vm4885_vm2 = vcmask 1043456   ;;  %v3170_v16 = vld [vmem:[#allocation2 + $0x1c] sm:$0xff] }
 0x2d3   : > { %v804_v19 = vsub.f32 1.0, %v803_v17  ;;  %v1094_v59 = vsub.s32 %v4269_v49, %v1093_v15  ;;  %2965 = vmatmul.msk.bf16.vlgmr.msrb.gmra.mxu2 %vm4877_vm5, %v1389_v39  ;;  %v3176_v49 = vld [vmem:[#allocation2 + $0x8] sm:$0xff]  ;;  %v1944_v35 = vsel %vm4885_vm2, %v3037_v46, 0  ;;  %vm4886_vm6 = vmmov %vm4885_vm2  ;;  %v1626_v47 = vshrl.u32 %v3172_v42, 16  ;;  %v3179_v17 = vld [vmem:[#allocation2 + $0x20] sm:$0xff] }
 0x2d4   : > { %1953 = vmatpush.bf16.msrb.mxu2 %v1944_v35  ;;  %v1618_v57 = vshrl.u32 %v2993_v28, 16  ;;  %v1621_v51 = vshll.u32 %v2993_v28, 16  ;;  %v1631_v58 = vrot.slane %v1629_v34, 4  ;;  %v1637_v12 = vrot.slane %v1635_v13, 3  ;;  %v3189_v34 = vld [vmem:[#allocation2 + $0xc] sm:$0xff] }
 0x2d5   : > { %v805_v50 = vmul.f32 %v3308_v29, %v804_v19  ;;  %vm1105_vm9 = vcmp.ne.s32.totalorder %v1094_v59, 0  ;;  %vm1114_vm14 = vcmp.lt.s32.totalorder %v1094_v59, 0  ;;  %v1132_v62 = vadd.s32 9, %v1094_v59 }
 0x2d6   : > { %2939 = vmatmul.msk.bf16.gmra.mxu3 %vm4878_vm15, %v1246_v20  ;;  %vm1123_vm1 = vmand %vm1114_vm14, %vm1105_vm9  ;;  %v1620_v8 = vrot.slane %v1618_v57, 3  ;;  %v1623_v32 = vrot.slane %v1621_v51, 4  ;;  %v1628_v53 = vrot.slane %v1626_v47, 3  ;;  %v1640_v36 = vrot.slane %v1638_v14, 4  ;;  %v3169_v20 = vld [vmem:[#allocation2 + $0x14] sm:$0xff]  ;;  %v3180_v51 = vld [vmem:[#allocation2 + $0x8] sm:$0xff] }
 0x2d7   : > { %v806_v41 = vadd.f32 %v3308_v29, %v805_v50  ;;  %v1141_v2 = vsel %vm1123_vm1, %v1132_v62, %v1094_v59  ;;  %vm4883_vm1 = vcmask 60416   ;;  %vm4887_vm9 = vmmov %vm4880_vm3 }
 0x2d8   : > { %vm4319_vm5 = vcmp.lt.s32.totalorder %v1141_v2, 8  ;;  %vm4888_vm14 = vmmov %vm4880_vm3  ;;  %v1624_v22 = vor.u32 %v1623_v32, %v1620_v8  ;;  %v1632_v56 = vor.u32 %v1631_v58, %v1628_v53  ;;  %v1892_v32 = vshll.u32 %v3180_v51, 16 }
 0x2d9   : > { %v810_v10 = vsel %vm809_vm10, %v3308_v29, %v806_v41  ;;  %vm4884_vm10 = vmmov %vm4880_vm3  ;;  %v1641_v29 = vor.u32 %v1640_v36, %v1637_v12  ;;  %v2156_v12 = vshrl.u32 %v3189_v34, 16 }
 0x2da   : > { %v815_v52 = vsel %vm812_vm0, %v814_v25, %v810_v10  ;;  %vm4889_vm15 = vmmov %vm4880_vm3  ;;  %vm4890_vm0 = vsmask.f32 4352  ;;  %v3114_v10 = vld [vmem:[#allocation2 + $0xc] sm:$0xe]  ;;  %v1894_v5 = vrot.slane %v1892_v32, 1 }
 0x2db   : > { %3082 = vmatmul.msk.bf16.gmra.mxu0 %vm4879_vm8, %v3187_v6  ;;  %v825_v55 = vmul.f32 %v815_v52, %v4274_v31  ;;  %v3085_v31 = vld [vmem:[%s4774_s5 + $0x1c] sm:$0xf]  ;;  %v1633_v30 = vsel %vm4890_vm0, %v1624_v22, %v1632_v56  ;;  %vm4891_vm8 = vmmov %vm4880_vm3  ;;  %v3194_v52 = vld [vmem:[#allocation2 + $0xc] sm:$0xf0] }
 0x2dc   : > { %3032 = vmatmul.msk.bf16.vlgmr.msra.gmra.mxu1 %vm4880_vm3, %v3176_v49  ;;  %v2210_v7 = vsel %vm4886_vm6, %v3085_v31, 0  ;;  %vm4895_vm6 = vmmov %vm4880_vm3 }
 0x2dd   : > { %v1177_v27 = vsel %vm4319_vm5, %v825_v55, 0.0  ;;  %2219 = vmatpush.bf16.msra.mxu3 %v2210_v7 }
 0x2de   : > { %v1191_v21 = vpack.c.bf16 %v1177_v27, %v1177_v27  ;;  %v3195_v27 = vld [vmem:[#allocation2 + $0x14] sm:$0xff] }
 0x2df   : > { %v2311_v31 = vrot.slane %v3195_v27, 1 }
 0x2e0   : > { %1200 = vst.msk [vmem:[#allocation2 + $0x28] sm:$0xf] %vm4883_vm1, %v1191_v21  ;;  %vm4892_vm1 = vmmov %vm4885_vm2  ;;  %v3115_v21 = vor.u32 %v3194_v52, %v3114_v10 }
 0x2e1   : > { %v2335_v9 = vsel %vm4892_vm1, %v3111_v26, 0  ;;  %vm4894_vm2 = vmmov %vm4890_vm0  ;;  %v3190_v26 = vld [vmem:[#allocation2 + $0x14] sm:$0xff] }
 0x2e2   : > { %2344 = vmatpush.bf16.msrb.mxu1 %v2335_v9  ;;  %v1642_v61 = vsel %vm4894_vm2, %v1632_v56, %v1641_v29  ;;  %v2310_v28 = vrot.slane %v3115_v21, 1  ;;  %v2158_v56 = vshll.u32 %v3189_v34, 16  ;;  %v2163_v36 = vshll.u32 %v3190_v26, 16  ;;  %v3183_v34 = vld [vmem:[#allocation2 + $0x20] sm:$0xff] }
 0x2e3   : > { %2966 = vmatmul.msk.bf16.gmra.mxu2 %vm4884_vm10, %v1388_v37  ;;  %vm4893_vm10 = vmmov %vm4880_vm3  ;;  %v2167_v10 = vshrl.u32 %v3190_v26, 16 }
 0x2e4   : > { %v2160_v9 = vrot.slane %v2158_v56, 1 }
 0x2e6   : > { %2940 = vmatmul.msk.bf16.gmra.mxu3 %vm4880_vm3, %v1245_v54  ;;  %v3174_v54 = vld [vmem:[#allocation2 + $0x1c] sm:$0xff] }
 0x2e7   : > { %v3188_v3 = vld [vmem:[#allocation2 + $0x24] sm:$0xff]  ;;  %v1644_v15 = vshrl.u32 %v3174_v54, 16  ;;  %v1647_v37 = vshll.u32 %v3174_v54, 16 }
 0x2e8   : > { %v1476_v39 = vld [vmem:[#allocation2 + $0x24] sm:$0xff]  }
 0x2e9   : > { %v1646_v19 = vrot.slane %v1644_v15, 3  ;;  %v1649_v44 = vrot.slane %v1647_v37, 4  ;;  %v1767_v23 = vunpack.c.h.b16 %v1476_v39  ;;  %v3175_v62 = vld [vmem:[#allocation2 + $0x24] sm:$0xff]  ;;  %v2165_v37 = vrot.slane %v2163_v36, 1 }
 0x2ea   : > { %v1653_v2 = vshrl.u32 %v3175_v62, 16  ;;  %v1656_v6 = vshll.u32 %v3175_v62, 16  ;;  %v3182_v62 = vld [vmem:[#allocation2 + $0x18] sm:$0xff]  ;;  %v3192_v32 = vld [vmem:[#allocation2 + $0x24] sm:$0xff] }
 0x2eb   : > { %3083 = vmatmul.msk.bf16.gmra.mxu0 %vm4887_vm9, %v3188_v3  ;;  %vm4896_vm9 = vmmov %vm4880_vm3  ;;  %v1650_v59 = vor.u32 %v1649_v44, %v1646_v19  ;;  %v1772_v41 = vpack.c.b16 %v1767_v23, %v1767_v23  ;;  %v1496_v3 = vunpack.c.l.b16 %v1476_v39 }
 0x2ec   : > { %3033 = vmatmul.msk.bf16.gmra.mxu1 %vm4888_vm14, %v3177_v60  ;;  %vm4897_vm14 = vmmov %vm4880_vm3  ;;  %v1655_v49 = vrot.slane %v1653_v2, 3  ;;  %v1658_v25 = vrot.slane %v1656_v6, 4  ;;  %v3196_v60 = vld [vmem:[#allocation2 + $0x1c] sm:$0xff]  ;;  %v1905_v6 = vshll.u32 %v3182_v62, 16 }
 0x2ed   : > { %v1501_v57 = vpack.c.b16 %v1496_v3, %v1496_v3  ;;  %v2313_v8 = vrot.slane %v3196_v60, 1 }
 0x2ee   : > { %v1659_v55 = vor.u32 %v1658_v25, %v1655_v49  ;;  %v3130_v49 = vld [vmem:[#allocation2 + $0x2c] sm:$0xf]  ;;  %v3198_v25 = vld [vmem:[#allocation2 + $0x2c] sm:$0x10] }
 0x2f3   : > { %2984 = vmatmul.msk.bf16.vlgmr.msra.gmra.mxu2 %vm4889_vm15, %v3167_v63  ;;  %vm4898_vm15 = vmmov %vm4890_vm0 }
 0x2f4   : > { %v1651_v50 = vsel %vm4898_vm15, %v1641_v29, %v1650_v59  ;;  %vm4899_vm0 = vmmov %vm4880_vm3 }
 0x2f5   : > { %vm4901_vm1 = vmmov %vm4899_vm0 }
 0x2f6   : > { %3010 = vmatmul.msk.bf16.vlgmr.msrb.gmra.mxu3 %vm4891_vm8, %v1633_v30  ;;  %vm4900_vm8 = vmmov %vm4899_vm0  ;;  %v3181_v30 = vld [vmem:[#allocation2 + $0x10] sm:$0xff] }
 0x2f7   : > { %vm4907_vm15 = vmmov %vm4899_vm0  ;;  %v1897_v13 = vshll.u32 %v3181_v30, 16  ;;  %v1901_v2 = vshrl.u32 %v3181_v30, 16 }
 0x2f9   : > { %v1899_v15 = vrot.slane %v1897_v13, 1 }
 0x2fc   : > { %3034 = vmatmul.msk.bf16.gmra.mxu1 %vm4893_vm10, %v3178_v18  ;;  %vm4902_vm10 = vmmov %vm4894_vm2  ;;  %vm2309_vm2 = vcmask 1046528   ;;  %v1890_v18 = vshrl.u32 %v3180_v51, 16 }
 0x2fd   : > { %v1660_v38 = vsel %vm4902_vm10, %v1650_v59, %v1659_v55  ;;  %v2312_v7 = vsel %vm2309_vm2, %v2310_v28, %v2311_v31  ;;  %v2314_v63 = vsel %vm2309_vm2, %v2311_v31, %v2313_v8  ;;  %vm4909_vm10 = vmmov %vm4901_vm1 }
 0x2fe   : > { %v1895_v29 = vor.u32 %v1894_v5, %v1890_v18 }
 0x303   : > { %2985 = vmatmul.msk.bf16.gmra.mxu2 %vm4880_vm3, %v3168_v43  ;;  %vm4903_vm3 = vmmov %vm4899_vm0 }
 0x306   : > { %3011 = vmatmul.msk.bf16.gmra.mxu3 %vm4895_vm6, %v1642_v61  ;;  %vm4904_vm6 = vmmov %vm4899_vm0  ;;  %v2161_v61 = vor.u32 %v2160_v9, %v2156_v12 }
 0x30c   : > { %3035 = vmatmul.msk.bf16.gmra.mxu1 %vm4896_vm9, %v3179_v17  ;;  %vm4905_vm9 = vmmov %vm4899_vm0  ;;  %v3197_v17 = vld [vmem:[#allocation2 + $0x24] sm:$0xff] }
 0x30d   : > { %v2315_v59 = vrot.slane %v3197_v17, 1  ;;  %v3104_v17 = vld [vmem:[#allocation2 + $0x2c] sm:$0xf] }
 0x30f   : > { %v1275_v46 = vpop.f32.mrf.mxu0 }
 0x313   : > { %2986 = vmatmul.msk.bf16.gmra.mxu2 %vm4897_vm14, %v3169_v20  ;;  %vm4906_vm14 = vmmov %vm4899_vm0 }
 0x314   : > { %v1417_v42 = vpop.f32.mrf.mxu1 }
 0x315   : > { %v4358_v35 = vadd.f32 %v1417_v42, %v1275_v46  ;;  %v3131_v46 = vor.u32 %v3198_v25, %v3130_v49  ;;  %v1907_v42 = vrot.slane %v1905_v6, 1  ;;  %v1917_v49 = vshrl.u32 %v3183_v34, 16 }
 0x316   : > { %3012 = vmatmul.msk.bf16.gmra.mxu3 %vm4899_vm0, %v1651_v50  ;;  %vm1888_vm0 = vsmask.f32 7424  ;;  %v2316_v50 = vsel %vm2309_vm2, %v2313_v8, %v2315_v59  ;;  %v2183_v25 = vshrl.u32 %v3192_v32, 16 }
 0x317   : > { %v1277_v53 = vpop.f32.mrf.mxu0  ;;  %v1900_v19 = vsel %vm1888_vm0, %v1895_v29, %v1899_v15  ;;  %v2166_v44 = vsel %vm1888_vm0, %v2161_v61, %v2165_v37  ;;  %v2317_v3 = vrot.slane %v3131_v46, 1  ;;  %v3056_v29 = vld [vmem:[#allocation2 + $0x28] sm:$0xf] }
 0x31c   : > { %3036 = vmatmul.msk.bf16.gmra.mxu1 %vm4900_vm8, %v1772_v41  ;;  %v1419_v58 = vpop.f32.mrf.mxu1  ;;  %vm4908_vm8 = vmmov %vm4901_vm1  ;;  %v3191_v41 = vld [vmem:[#allocation2 + $0x1c] sm:$0xff] }
 0x31d   : > { %v1280_v47 = vpop.f32.mrf.mxu3  ;;  %v4364_v22 = vadd.f32 %v1419_v58, %v1277_v53  ;;  %v2171_v52 = vshll.u32 %v3191_v41, 16  ;;  %v1909_v53 = vshrl.u32 %v3182_v62, 16  ;;  %v1913_v58 = vshll.u32 %v3183_v34, 16 }
 0x31e   : > { %v2175_v56 = vshrl.u32 %v3191_v41, 16 }
 0x31f   : > { %v2173_v28 = vrot.slane %v2171_v52, 1  ;;  %v1911_v26 = vor.u32 %v1909_v53, %v1907_v42  ;;  %v1915_v13 = vrot.slane %v1913_v58, 1 }
 0x321   : > { %v2177_v9 = vor.u32 %v2175_v56, %v2173_v28  ;;  %v1916_v36 = vsel %vm1888_vm0, %v1911_v26, %v1915_v13  ;;  %v1919_v52 = vor.u32 %v1917_v49, %v1915_v13 }
 0x323   : > { %2987 = vmatmul.msk.bf16.gmra.mxu2 %vm4901_vm1, %v3170_v16  ;;  %v2169_v16 = vor.u32 %v2167_v10, %v2165_v37 }
 0x325   : > { %v1282_v14 = vpop.f32.mrf.mxu3 }
 0x326   : > { %3013 = vmatmul.msk.bf16.gmra.mxu3 %vm4903_vm3, %v1660_v38  ;;  %vm4910_vm3 = vmmov %vm4901_vm1 }
 0x32c   : > { %3132 = vmatmul.msk.bf16.vlgmr.msrb.gmra.mxu1 %vm4904_vm6, %v2312_v7  ;;  %v2174_v7 = vsel %vm1888_vm0, %v2169_v16, %v2173_v28  ;;  %vm4911_vm6 = vmmov %vm4901_vm1 }
 0x333   : > { %2988 = vmatmul.msk.bf16.gmra.mxu2 %vm4905_vm9, %v1501_v57  ;;  %vm4912_vm9 = vmmov %vm4901_vm1 }
 0x336   : > { %3014 = vmatmul.msk.bf16.gmra.mxu3 %vm4906_vm14, %v1659_v55  ;;  %v1903_v55 = vor.u32 %v1901_v2, %v1899_v15  ;;  %vm4914_vm14 = vmmov %vm4901_vm1  ;;  %v3193_v15 = vld [vmem:[#allocation2 + $0x2c] sm:$0x10] }
 0x338   : > { %v1908_v31 = vsel %vm1888_vm0, %v1903_v55, %v1907_v42 }
 0x339   : > { %v1422_v43 = vpop.f32.mrf.mxu1 }
 0x33a   : > { %v4368_v54 = vadd.f32 %v1422_v43, %v1280_v47  ;;  %v2318_v47 = vsel %vm2309_vm2, %v2315_v59, %v2317_v3  ;;  %vm4913_vm2 = vmmov %vm4901_vm1  ;;  %v3184_v43 = vld [vmem:[#allocation2 + $0x28] sm:$0x10] }
 0x33c   : > { %3133 = vmatmul.msk.bf16.gmra.mxu1 %vm4907_vm15, %v2314_v63  ;;  %v2179_v63 = vshll.u32 %v3192_v32, 16  ;;  %vm4915_vm15 = vmmov %vm4901_vm1 }
 0x33e   : > { %v2181_v12 = vrot.slane %v2179_v63, 1 }
 0x340   : > { %v2182_v61 = vsel %vm1888_vm0, %v2177_v9, %v2181_v12 }
 0x341   : > { %v1424_v39 = vpop.f32.mrf.mxu1 }
 0x342   : > { %v4374_v23 = vadd.f32 %v1424_v39, %v1282_v14  ;;  %v2014_v39 = vld [vmem:[#allocation2 + $0x2c] sm:$0xf] }
 0x343   : > { %3058 = vmatmul.msk.bf16.vlgmr.msrb.gmra.mxu2 %vm4908_vm8, %v1900_v19  ;;  %v3057_v19 = vor.u32 %v3184_v43, %v3056_v29  ;;  %v2034_v62 = vunpack.c.l.b16 %v2014_v39  ;;  %vm4916_vm8 = vmmov %vm4901_vm1 }
 0x345   : > { %v1921_v41 = vshll.u32 %v3057_v19, 16  ;;  %v2039_v2 = vpack.c.b16 %v2034_v62, %v2034_v62  ;;  %v1925_v53 = vshrl.u32 %v3057_v19, 16  ;;  %v2067_v62 = vpop.f32.mrf.mxu0 }
 0x346   : > { %3106 = vmatmul.msk.bf16.vlgmr.msra.gmra.mxu3 %vm4901_vm1, %v2166_v44 }
 0x347   : > { %3084 = vmatmul.msk.bf16.gmra.mxu0 %vm4916_vm8, %v2039_v2  ;;  %v1923_v55 = vrot.slane %v1921_v41, 1 }
 0x349   : > { %v1285_v20 = vpop.f32.mrf.mxu3  ;;  %v1427_v27 = vpop.f32.mrf.mxu1  ;;  %v1924_v42 = vsel %vm1888_vm0, %v1919_v52, %v1923_v55 }
 0x34a   : > { %v4378_v38 = vadd.f32 %v1427_v27, %v1285_v20  ;;  %v3105_v20 = vor.u32 %v3193_v15, %v3104_v17 }
 0x34c   : > { %3134 = vmatmul.msk.bf16.gmra.mxu1 %vm4909_vm10, %v2316_v50  ;;  %v2187_v6 = vshll.u32 %v3105_v20, 16  ;;  %vm4917_vm10 = vmmov %vm4901_vm1  ;;  %v2191_v56 = vshrl.u32 %v3105_v20, 16 }
 0x34e   : > { %v2189_v16 = vrot.slane %v2187_v6, 1 }
 0x351   : > { %v1287_v21 = vpop.f32.mrf.mxu3  ;;  %v1429_v51 = vpop.f32.mrf.mxu1 }
 0x352   : > { %v4389_v8 = vadd.f32 %v1429_v51, %v1287_v21  ;;  %v2185_v21 = vor.u32 %v2183_v25, %v2181_v12 }
 0x353   : > { %3059 = vmatmul.msk.bf16.gmra.mxu2 %vm4910_vm3, %v1908_v31  ;;  %vm4918_vm3 = vmmov %vm4901_vm1 }
 0x354   : > { %v2190_v28 = vsel %vm1888_vm0, %v2185_v21, %v2189_v16  ;;  %vm4919_vm0 = vmmov %vm4901_vm1 }
 0x356   : > { %3107 = vmatmul.msk.bf16.gmra.mxu3 %vm4911_vm6, %v2174_v7  ;;  %v4384_v60 = vpop.f32.mrf.mxu2 }
 0x359   : > { %v4386_v57 = vpop.f32.mrf.mxu3  ;;  %v4392_v18 = vpop.f32.mrf.mxu1 }
 0x35a   : > { %v1456_v52 = vadd.f32 %v4384_v60, %v4386_v57 }
 0x35c   : > { %3135 = vmatmul.msk.bf16.gmra.mxu1 %vm4912_vm9, %v2318_v47 }
 0x35e   : > { %v1434_v30 = vpop.f32.mrf.mxu2 }
 0x361   : > { %v1292_v5 = vpop.f32.mrf.mxu3  ;;  %v1802_v59 = vpop.f32.mrf.mxu1 }
 0x362   : > { %v4394_v14 = vadd.f32 %v1434_v30, %v1292_v5  ;;  %v1927_v30 = vor.u32 %v1925_v53, %v1923_v55  ;;  %v2193_v5 = vor.u32 %v2191_v56, %v2189_v16 }
 0x363   : > { %3060 = vmatmul.msk.bf16.gmra.mxu2 %vm4913_vm2, %v1916_v36 }
 0x366   : > { %3108 = vmatmul.msk.bf16.gmra.mxu3 %vm4914_vm14, %v2182_v61  ;;  %v1437_v37 = vpop.f32.mrf.mxu2 }
 0x369   : > { %v1295_v44 = vpop.f32.mrf.mxu3  ;;  %v1805_v46 = vpop.f32.mrf.mxu1 }
 0x36a   : > { %v4400_v50 = vadd.f32 %v1437_v37, %v1295_v44 }
 0x36c   : > { %3136 = vmatmul.msk.bf16.gmra.mxu1 %vm4915_vm15, %v2317_v3 }
 0x36e   : > { %v1439_v10 = vpop.f32.mrf.mxu2 }
 0x36f   : > { %v2069_v10 = vpop.f32.mrf.mxu0 }
 0x371   : > { %v1297_v27 = vpop.f32.mrf.mxu3  ;;  %v1807_v51 = vpop.f32.mrf.mxu1 }
 0x373   : > { %3061 = vmatmul.msk.bf16.gmra.mxu2 %vm4901_vm1, %v1924_v42 }
 0x376   : > { %3109 = vmatmul.msk.bf16.gmra.mxu3 %vm4917_vm10, %v2190_v28  ;;  %v1529_v31 = vpop.f32.mrf.mxu2 }
 0x377   : > { %v1562_v7 = vadd.f32 %v1529_v31, %v4358_v35  ;;  %v2072_v42 = vpop.f32.mrf.mxu0 }
 0x379   : > { %v1688_v3 = vpop.f32.mrf.mxu3  ;;  %v1810_v63 = vpop.f32.mrf.mxu1 }
 0x37a   : > { %v1721_v47 = vadd.f32 %v1688_v3, %v1562_v7 }
 0x37c   : > { %v1833_v15 = vadd.f32 %v4392_v18, %v1721_v47 }
 0x37e   : > { %v1531_v34 = vpop.f32.mrf.mxu2 }
 0x37f   : > { %v1563_v32 = vadd.f32 %v1531_v34, %v4364_v22  ;;  %v4425_v34 = vpop.f32.mrf.mxu0 }
 0x381   : > { %v1690_v58 = vpop.f32.mrf.mxu3  ;;  %v1812_v12 = vpop.f32.mrf.mxu1 }
 0x382   : > { %v1722_v26 = vadd.f32 %v1690_v58, %v1563_v32 }
 0x383   : > { %3062 = vmatmul.msk.bf16.gmra.mxu2 %vm4918_vm3, %v1927_v30 }
 0x384   : > { %v1834_v41 = vadd.f32 %v1802_v59, %v1722_v26 }
 0x386   : > { %3110 = vmatmul.msk.bf16.gmra.mxu3 %vm4919_vm0, %v2193_v5  ;;  %v1534_v9 = vpop.f32.mrf.mxu2 }
 0x387   : > { %v1564_v35 = vadd.f32 %v1534_v9, %v4368_v54  ;;  %v2430_v9 = vld [vmem:[#allocation7 + $0x78] sm:$0xff] }
 0x388   : > { %2447 = vmatpush.msra.mxu2 %v2430_v9  ;;  %2500 = vmatpush.msrb.mxu0 %v2430_v9 }
 0x389   : > { %v1693_v13 = vpop.f32.mrf.mxu3  ;;  %v1815_v61 = vpop.f32.mrf.mxu1 }
 0x38a   : > { %v1723_v36 = vadd.f32 %v1693_v13, %v1564_v35  ;;  %v2429_v35 = vld [vmem:[#allocation7 + $0x70] sm:$0xff] }
 0x38b   : > { %2448 = vmatpush.msra.mxu2 %v2429_v35  ;;  %2501 = vmatpush.msrb.mxu0 %v2429_v35 }
 0x38e   : > { %v1536_v29 = vpop.f32.mrf.mxu2 }
 0x38f   : > { %v1565_v22 = vadd.f32 %v1536_v29, %v4374_v23  ;;  %v1835_v23 = vadd.f32 %v1805_v46, %v1723_v36 }
 0x391   : > { %v1695_v43 = vpop.f32.mrf.mxu3  ;;  %v1817_v39 = vpop.f32.mrf.mxu1 }
 0x392   : > { %v1724_v17 = vadd.f32 %v1695_v43, %v1565_v22 }
 0x394   : > { %v4419_v16 = vadd.f32 %v1807_v51, %v1724_v17 }
 0x396   : > { %v1539_v37 = vpop.f32.mrf.mxu2 }
 0x397   : > { %v1566_v19 = vadd.f32 %v1539_v37, %v4378_v38  ;;  %v2428_v37 = vld [vmem:[#allocation7 + $0x68] sm:$0xff] }
 0x398   : > { %2449 = vmatpush.msra.mxu2 %v2428_v37  ;;  %2502 = vmatpush.msrb.mxu0 %v2428_v37  ;;  %v2418_v37 = vld [vmem:[#allocation7 + $0x18] sm:$0xff] }
 0x399   : > { %v1698_v44 = vpop.f32.mrf.mxu3  ;;  %v1820_v49 = vpop.f32.mrf.mxu1 }
 0x39a   : > { %v1725_v20 = vadd.f32 %v1698_v44, %v1566_v19  ;;  %v2427_v19 = vld [vmem:[#allocation7 + $0x60] sm:$0xff] }
 0x39b   : > { %2450 = vmatpush.msra.mxu2 %v2427_v19  ;;  %2503 = vmatpush.msrb.mxu0 %v2427_v19  ;;  %v2417_v19 = vld [vmem:[#allocation7 + $0x10] sm:$0xff] }
 0x39c   : > { %v4422_v3 = vadd.f32 %v1810_v63, %v1725_v20 }
 0x39e   : > { %v1541_v54 = vpop.f32.mrf.mxu2 }
 0x39f   : > { %v1567_v2 = vadd.f32 %v1541_v54, %v4389_v8 }
 0x3a1   : > { %v1700_v6 = vpop.f32.mrf.mxu3  ;;  %v1822_v38 = vpop.f32.mrf.mxu1 }
 0x3a2   : > { %v1726_v25 = vadd.f32 %v1700_v6, %v1567_v2 }
 0x3a4   : > { %v4427_v53 = vadd.f32 %v1812_v12, %v1726_v25 }
 0x3a6   : > { %v1544_v18 = vpop.f32.mrf.mxu2 }
 0x3a7   : > { %v1568_v55 = vadd.f32 %v1544_v18, %v1456_v52  ;;  %v2426_v52 = vld [vmem:[#allocation7 + $0x58] sm:$0xff] }
 0x3a8   : > { %2451 = vmatpush.msra.mxu2 %v2426_v52  ;;  %2504 = vmatpush.msrb.mxu0 %v2426_v52 }
 0x3a9   : > { %v1703_v27 = vpop.f32.mrf.mxu3  ;;  %v2346_v31 = vpop.f32.mrf.mxu1 }
 0x3aa   : > { %v1727_v21 = vadd.f32 %v1703_v27, %v1568_v55  ;;  %v2425_v27 = vld [vmem:[#allocation7 + $0x50] sm:$0xff] }
 0x3ab   : > { %2452 = vmatpush.msra.mxu2 %v2425_v27  ;;  %2505 = vmatpush.msrb.mxu0 %v2425_v27 }
 0x3ac   : > { %v4433_v30 = vadd.f32 %v1815_v61, %v1727_v21 }
 0x3ae   : > { %v1546_v59 = vpop.f32.mrf.mxu2 }
 0x3af   : > { %v1569_v28 = vadd.f32 %v1546_v59, %v4394_v14  ;;  %v4431_v14 = vpop.f32.mrf.mxu0 }
 0x3b1   : > { %v1705_v8 = vpop.f32.mrf.mxu3  ;;  %v2348_v57 = vpop.f32.mrf.mxu1 }
 0x3b2   : > { %v1728_v7 = vadd.f32 %v1705_v8, %v1569_v28 }
 0x3b4   : > { %v4437_v36 = vadd.f32 %v1817_v39, %v1728_v7  ;;  %v2422_v7 = vld [vmem:[#allocation7 + $0x38] sm:$0xff] }
 0x3b6   : > { %v1549_v46 = vpop.f32.mrf.mxu2 }
 0x3b7   : > { %v1570_v47 = vadd.f32 %v1549_v46, %v4400_v50  ;;  %v4439_v29 = vpop.f32.mrf.mxu0  ;;  %v2421_v46 = vld [vmem:[#allocation7 + $0x30] sm:$0xff] }
 0x3b9   : > { %v1708_v60 = vpop.f32.mrf.mxu3  ;;  %v4429_v56 = vpop.f32.mrf.mxu1 }
 0x3ba   : > { %v1729_v32 = vadd.f32 %v1708_v60, %v1570_v47  ;;  %v2420_v60 = vld [vmem:[#allocation7 + $0x28] sm:$0xff] }
 0x3be   : > { %v1551_v51 = vpop.f32.mrf.mxu2 }
 0x3bf   : > { %v4449_v54 = vpop.f32.mrf.mxu0  ;;  %v2419_v51 = vld [vmem:[#allocation7 + $0x20] sm:$0xff] }
 0x3c1   : > { %v1710_v58 = vpop.f32.mrf.mxu3  ;;  %v4435_v50 = vpop.f32.mrf.mxu1 }
 0x3c6   : > { %v1955_v63 = vpop.f32.mrf.mxu2 }
 0x3c7   : > { %v1988_v26 = vadd.f32 %v1955_v63, %v1833_v15  ;;  %v2084_v21 = vpop.f32.mrf.mxu0 }
 0x3c9   : > { %v2221_v5 = vpop.f32.mrf.mxu3  ;;  %v2100_v13 = vadd.f32 %v2067_v62, %v1988_v26  ;;  %v4443_v15 = vpop.f32.mrf.mxu1  ;;  %v4445_v62 = vadd.f32 %v1820_v49, %v1729_v32  ;;  %v2424_v49 = vld [vmem:[#allocation7 + $0x48] sm:$0xff] }
 0x3ca   : > { %2453 = vmatpush.msra.mxu2 %v2424_v49  ;;  %2506 = vmatpush.msrb.mxu0 %v2424_v49 }
 0x3cb   : > { %v2254_v12 = vadd.f32 %v2221_v5, %v2100_v13 }
 0x3cd   : > { %v4441_v22 = vadd.f32 %v2346_v31, %v2254_v12  ;;  %v2423_v31 = vld [vmem:[#allocation7 + $0x40] sm:$0xff] }
 0x3ce   : > { %v1957_v43 = vpop.f32.mrf.mxu2  ;;  %2454 = vmatpush.msra.mxu2 %v2423_v31  ;;  %2507 = vmatpush.msrb.mxu0 %v2423_v31 }
 0x3cf   : > { %v1989_v61 = vadd.f32 %v1957_v43, %v1834_v41  ;;  %v4455_v28 = vpop.f32.mrf.mxu0 }
 0x3d0   : > { %2455 = vmatpush.msra.mxu2 %v2422_v7  ;;  %2508 = vmatpush.msrb.mxu0 %v2422_v7 }
 0x3d1   : > { %v2223_v17 = vpop.f32.mrf.mxu3  ;;  %v2101_v44 = vadd.f32 %v2069_v10, %v1989_v61  ;;  %v4451_v25 = vpop.f32.mrf.mxu1 }
 0x3d2   : > { %2456 = vmatpush.msra.mxu2 %v2421_v46  ;;  %2509 = vmatpush.msrb.mxu0 %v2421_v46 }
 0x3d3   : > { %v2255_v20 = vadd.f32 %v2223_v17, %v2101_v44 }
 0x3d4   : > { %2457 = vmatpush.msra.mxu2 %v2420_v60  ;;  %2510 = vmatpush.msrb.mxu0 %v2420_v60 }
 0x3d5   : > { %v4447_v39 = vadd.f32 %v2348_v57, %v2255_v20 }
 0x3d6   : > { %v1960_v2 = vpop.f32.mrf.mxu2  ;;  %2458 = vmatpush.msra.mxu2 %v2419_v51  ;;  %2511 = vmatpush.msrb.mxu0 %v2419_v51 }
 0x3d7   : > { %v1990_v6 = vadd.f32 %v1960_v2, %v1835_v23  ;;  %v2089_v32 = vpop.f32.mrf.mxu0  ;;  %v2407_v2 = vsel %vm3941_vm13, %v4447_v39, 0.0  ;;  %vm4921_vm13 = vnez %v4866_v48 }
 0x3d8   : > { %2459 = vmatpush.msra.mxu2 %v2418_v37  ;;  %2512 = vmatpush.msrb.mxu0 %v2418_v37 }
 0x3d9   : > { %v2226_v41 = vpop.f32.mrf.mxu3  ;;  %v2102_v18 = vadd.f32 %v2072_v42, %v1990_v6  ;;  %v4453_v38 = vpop.f32.mrf.mxu1 }
 0x3da   : > { %2460 = vmatpush.msra.mxu2 %v2417_v19  ;;  %2513 = vmatpush.msrb.mxu0 %v2417_v19 }
 0x3db   : > { %v2256_v13 = vadd.f32 %v2226_v41, %v2102_v18 }
 0x3de   : > { %v1962_v55 = vpop.f32.mrf.mxu2 }
 0x3df   : > { %v1991_v58 = vadd.f32 %v1962_v55, %v4419_v16  ;;  %v2381_v16 = vadd.f32 %v4429_v56, %v2256_v13  ;;  %v2406_v56 = vsel %vm3934_vm11, %v4441_v22, 0.0  ;;  %vm4920_vm11 = vnez %v4859_v1 }
 0x3e1   : > { %v2228_v10 = vpop.f32.mrf.mxu3  ;;  %v4457_v8 = vpop.f32.mrf.mxu1  ;;  %v2103_v9 = vadd.f32 %v4425_v34, %v1991_v58 }
 0x3e3   : > { %v2257_v43 = vadd.f32 %v2228_v10, %v2103_v9 }
 0x3e6   : > { %v1965_v59 = vpop.f32.mrf.mxu2 }
 0x3e7   : > { %v1992_v26 = vadd.f32 %v1965_v59, %v4422_v3  ;;  %v2382_v3 = vadd.f32 %v4435_v50, %v2257_v43  ;;  %v2408_v50 = vsel %vm4020_vm12, %v2381_v16, 0.0  ;;  %vm4922_vm12 = vnez %v4868_v4 }
 0x3e9   : > { %v2231_v23 = vpop.f32.mrf.mxu3  ;;  %v4459_v57 = vpop.f32.mrf.mxu1  ;;  %v2104_v17 = vadd.f32 %v4431_v14, %v1992_v26 }
 0x3eb   : > { %v2258_v44 = vadd.f32 %v2231_v23, %v2104_v17 }
 0x3ed   : > { %v2383_v52 = vadd.f32 %v4443_v15, %v2258_v44 }
 0x3ee   : > { %v1967_v42 = vpop.f32.mrf.mxu2 }
 0x3ef   : > { %v1993_v35 = vadd.f32 %v1967_v42, %v4427_v53  ;;  %v2416_v53 = vld [vmem:[#allocation7 + $0x8] sm:$0xff]  ;;  %v2410_v33 = vsel %vm4216_vm7, %v2383_v52, 0.0 }
 0x3f0   : > { %2461 = vmatpush.msra.mxu2 %v2416_v53  ;;  %2514 = vmatpush.msrb.mxu0 %v2416_v53 }
 0x3f1   : > { %v2233_v47 = vpop.f32.mrf.mxu3  ;;  %v2368_v12 = vpop.f32.mrf.mxu1  ;;  %v2105_v20 = vadd.f32 %v4439_v29, %v1993_v35  ;;  %v2415_v29 = vld [vmem:[#allocation7] sm:$0xff] }
 0x3f2   : > { %2462 = vmatpush.msra.mxu2 %v2415_v29  ;;  %2515 = vmatpush.msrb.mxu0 %v2415_v29 }
 0x3f3   : > { %v2259_v14 = vadd.f32 %v2233_v47, %v2105_v20 }
 0x3f5   : > { %v2384_v18 = vadd.f32 %v4451_v25, %v2259_v14 }
 0x3f6   : > { %v1970_v63 = vpop.f32.mrf.mxu2 }
 0x3f7   : > { %v1994_v61 = vadd.f32 %v1970_v63, %v4433_v30  ;;  %v2411_v49 = vsel %vm4920_vm11, %v2384_v18, 0.0 }
 0x3f9   : > { %v2236_v5 = vpop.f32.mrf.mxu3  ;;  %v2106_v6 = vadd.f32 %v4449_v54, %v1994_v61  ;;  %v2409_v54 = vsel %vm4057_vm4, %v2382_v3, 0.0 }
 0x3fb   : > { %v2260_v24 = vadd.f32 %v2236_v5, %v2106_v6 }
 0x3fd   : > { %v2385_v22 = vadd.f32 %v4453_v38, %v2260_v24 }
 0x3fe   : > { %v1972_v34 = vpop.f32.mrf.mxu2 }
 0x3ff   : > { %v1995_v30 = vadd.f32 %v1972_v34, %v4437_v36  ;;  %v2433_v36 = vadd.f32 %v2407_v2, %v2406_v56  ;;  %v2412_v23 = vsel %vm4921_vm13, %v2385_v22, 0.0 }
 0x401   : > { %v2238_v41 = vpop.f32.mrf.mxu3  ;;  %v2107_v39 = vadd.f32 %v2084_v21, %v1995_v30  ;;  %v2434_v45 = vadd.f32 %v2433_v36, %v2408_v50 }
 0x403   : > { %v2261_v55 = vadd.f32 %v2238_v41, %v2107_v39  ;;  %v2435_v15 = vadd.f32 %v2434_v45, %v2409_v54 }
 0x405   : > { %v2386_v40 = vadd.f32 %v4457_v8, %v2261_v55  ;;  %v2436_v25 = vadd.f32 %v2435_v15, %v2410_v33 }
 0x406   : > { %v1975_v10 = vpop.f32.mrf.mxu2 }
 0x407   : > { %v1996_v27 = vadd.f32 %v1975_v10, %v4445_v62  ;;  %v2437_v0 = vadd.f32 %v2436_v25, %v2411_v49  ;;  %v2413_v38 = vsel %vm4922_vm12, %v2386_v40, 0.0 }
 0x409   : > { %v2241_v21 = vpop.f32.mrf.mxu3  ;;  %v2108_v59 = vadd.f32 %v4455_v28, %v1996_v27  ;;  %v2438_v42 = vadd.f32 %v2437_v0, %v2412_v23  ;;  %v3269_v0 = vld [vmem:[%s4776_s7] ss:$0 sm:$0xff] }
 0x40b   : > { %v2262_v31 = vadd.f32 %v2241_v21, %v2108_v59  ;;  %v2439_v1 = vadd.f32 %v2438_v42, %v2413_v38 }
 0x40d   : > { %v2387_v62 = vadd.f32 %v4459_v57, %v2262_v31 }
 0x40e   : > { %v1977_v7 = vpop.f32.mrf.mxu2 }
 0x40f   : > { %v2414_v8 = vsel %vm4319_vm5, %v2387_v62, 0.0  ;;  %v3270_v7 = vld [vmem:[%s4777_s8] ss:$0 sm:$0xff] }
 0x410   : > { %v2440_v47 = vadd.f32 %v2439_v1, %v2414_v8 }
 0x411   : > { %v2243_v46 = vpop.f32.mrf.mxu3 }
 0x412   : > { %v2441_v60 = vrot.slane %v2440_v47, 4 }
 0x414   : > { %v2442_v28 = vadd.f32 %v2441_v60, %v2440_v47 }
 0x416   : > { %v2443_v32 = vrot.slane %v2442_v28, 2 }
 0x418   : > { %v2444_v48 = vadd.f32 %v2443_v32, %v2442_v28 }
 0x41a   : > { %v2445_v51 = vrot.slane %v2444_v48, 1 }
 0x41c   : > { %v2446_v58 = vadd.f32 %v2445_v51, %v2444_v48 }
 0x41e   : > { %2463 = vmatmul.f32.vlgmr.msra.gmra.mxu2 %v2446_v58 }
 0x4a1   : > { %v2464_v4 = vpop.f32.mrf.mxu2 }
 0x4a2   : > { %v2467_v63 = vperm.slane %v2464_v4, 0  ;;  %v2520_v18 = vmul.f32 %v2464_v4, %v2464_v4 }
 0x4a4   : > { %v2468_v26 = vsub.f32 %v2406_v56, %v2467_v63  ;;  %v2469_v5 = vsub.f32 %v2407_v2, %v2467_v63  ;;  %v2470_v9 = vsub.f32 %v2408_v50, %v2467_v63  ;;  %v2471_v57 = vsub.f32 %v2409_v54, %v2467_v63 }
 0x4a5   : > { %v2472_v12 = vsub.f32 %v2410_v33, %v2467_v63  ;;  %v2473_v61 = vsub.f32 %v2411_v49, %v2467_v63  ;;  %v2474_v19 = vsub.f32 %v2412_v23, %v2467_v63  ;;  %v2475_v20 = vsub.f32 %v2413_v38, %v2467_v63 }
 0x4a6   : > { %v2477_v35 = vmul.f32 %v2468_v26, %v2468_v26  ;;  %v2478_v13 = vmul.f32 %v2469_v5, %v2469_v5  ;;  %v2479_v11 = vmul.f32 %v2470_v9, %v2470_v9  ;;  %v2480_v17 = vmul.f32 %v2471_v57, %v2471_v57 }
 0x4a7   : > { %v2481_v16 = vmul.f32 %v2472_v12, %v2472_v12  ;;  %v2482_v3 = vmul.f32 %v2473_v61, %v2473_v61  ;;  %v2476_v53 = vsub.f32 %v2414_v8, %v2467_v63  ;;  %v2483_v30 = vmul.f32 %v2474_v19, %v2474_v19 }
 0x4a8   : > { %v2486_v43 = vadd.f32 %v2478_v13, %v2477_v35  ;;  %v2484_v2 = vmul.f32 %v2475_v20, %v2475_v20  ;;  %v2521_v55 = vmul.f32 0.125, %v2520_v18 }
 0x4a9   : > { %v2485_v41 = vmul.f32 %v2476_v53, %v2476_v53 }
 0x4aa   : > { %v2487_v37 = vadd.f32 %v2486_v43, %v2479_v11 }
 0x4ac   : > { %v2488_v44 = vadd.f32 %v2487_v37, %v2480_v17 }
 0x4ae   : > { %v2489_v34 = vadd.f32 %v2488_v44, %v2481_v16 }
 0x4b0   : > { %v2490_v14 = vadd.f32 %v2489_v34, %v2482_v3 }
 0x4b2   : > { %v2491_v6 = vadd.f32 %v2490_v14, %v2483_v30 }
 0x4b4   : > { %v2492_v56 = vadd.f32 %v2491_v6, %v2484_v2 }
 0x4b6   : > { %v2493_v29 = vadd.f32 %v2492_v56, %v2485_v41 }
 0x4b8   : > { %v2494_v50 = vrot.slane %v2493_v29, 4 }
 0x4ba   : > { %v2495_v52 = vadd.f32 %v2494_v50, %v2493_v29 }
 0x4bc   : > { %v2496_v24 = vrot.slane %v2495_v52, 2 }
 0x4be   : > { %v2497_v39 = vadd.f32 %v2496_v24, %v2495_v52 }
 0x4c0   : > { %v2498_v36 = vrot.slane %v2497_v39, 1 }
 0x4c2   : > { %v2499_v54 = vadd.f32 %v2498_v36, %v2497_v39 }
 0x4c4   : > { %2516 = vmatmul.f32.vlgmr.msrb.gmra.mxu0 %v2499_v54 }
 0x541   : > { %v2517_v45 = vpop.f32.mrf.mxu0 }
 0x542   : > { %v2522_v33 = vsub.f32 %v2517_v45, %v2521_v55 }
 0x544   : > { %v2523_v22 = vmax.f32 %v2522_v33, 0.0 }
 0x546   : > { %v2524_v15 = vadd.f32 1e-05, %v2523_v22 }
 0x548   : > { %3309 = vrsqrt.f32 %v2524_v15  ;;  %vm2531_vm7 = vweird.f32 %v2524_v15 }
 0x54e   : > { %v3310_v10 = vpop.eup %3309 }
 0x54f   : > { %v2526_v27 = vmul.f32 %v3310_v10, %v2524_v15  ;;  %vm2532_vm4 = vweird.f32 %v3310_v10 }
 0x550   : > { %vm2533_vm5 = vmor %vm2531_vm7, %vm2532_vm4 }
 0x551   : > { %v2527_v49 = vmul.f32 %v3310_v10, %v2526_v27 }
 0x553   : > { %v2528_v40 = vmul.f32 0.5, %v2527_v49 }
 0x555   : > { %v2529_v21 = vsub.f32 1.5, %v2528_v40 }
 0x557   : > { %v2530_v25 = vmul.f32 %v3310_v10, %v2529_v21 }
 0x559   : > { %v2534_v59 = vsel %vm2533_vm5, %v3310_v10, %v2530_v25 }
 0x55a   : > { %v2535_v23 = vperm.slane %v2534_v59, 0 }
 0x55c   : > { %v2536_v38 = vmul.f32 %v2535_v23, %v2468_v26  ;;  %v2537_v31 = vmul.f32 %v2535_v23, %v2469_v5  ;;  %v2538_v42 = vmul.f32 %v2535_v23, %v2470_v9  ;;  %v2539_v62 = vmul.f32 %v2535_v23, %v2471_v57 }
 0x55d   : > { %v2540_v1 = vmul.f32 %v2535_v23, %v2472_v12  ;;  %v2541_v8 = vmul.f32 %v2535_v23, %v2473_v61  ;;  %v2542_v46 = vmul.f32 %v2535_v23, %v2474_v19  ;;  %v2543_v47 = vmul.f32 %v2535_v23, %v2475_v20 }
 0x55e   : > { %v2544_v60 = vmul.f32 %v2535_v23, %v2476_v53  ;;  %v2548_v28 = vmul.f32 %v3269_v0, %v2536_v38  ;;  %v2549_v32 = vmul.f32 %v3269_v0, %v2537_v31  ;;  %v2550_v48 = vmul.f32 %v3269_v0, %v2538_v42 }
 0x55f   : > { %v2551_v51 = vmul.f32 %v3269_v0, %v2539_v62  ;;  %v2552_v58 = vmul.f32 %v3269_v0, %v2540_v1  ;;  %v2553_v4 = vmul.f32 %v3269_v0, %v2541_v8  ;;  %v2554_v63 = vmul.f32 %v3269_v0, %v2542_v46 }
 0x560   : > { %v2555_v26 = vmul.f32 %v3269_v0, %v2543_v47  ;;  %v2556_v5 = vmul.f32 %v3269_v0, %v2544_v60  ;;  %v4505_v9 = vadd.f32 %v3270_v7, %v2548_v28  ;;  %v4507_v57 = vadd.f32 %v3270_v7, %v2549_v32 }
 0x561   : > { %v4509_v35 = vadd.f32 %v3270_v7, %v2550_v48  ;;  %v4511_v13 = vadd.f32 %v3270_v7, %v2551_v51  ;;  %v4513_v12 = vadd.f32 %v3270_v7, %v2552_v58  ;;  %v4515_v11 = vadd.f32 %v3270_v7, %v2553_v4 }
 0x562   : > { %v4517_v43 = vadd.f32 %v3270_v7, %v2554_v63  ;;  %v3137_v61 = vmul.f32 -1.442695, %v4505_v9  ;;  %v4520_v17 = vadd.f32 %v3270_v7, %v2555_v26  ;;  %v3138_v37 = vmul.f32 -1.442695, %v4507_v57 }
 0x563   : > { %v3139_v19 = vmul.f32 -1.442695, %v4509_v35  ;;  %v3140_v16 = vmul.f32 -1.442695, %v4511_v13  ;;  %v4525_v44 = vadd.f32 %v3270_v7, %v2556_v5  ;;  %v3141_v20 = vmul.f32 -1.442695, %v4513_v12 }
 0x564   : > { %3311 = vpow2.f32 %v3137_v61  ;;  %v3142_v3 = vmul.f32 -1.442695, %v4515_v11  ;;  %v3143_v34 = vmul.f32 -1.442695, %v4517_v43  ;;  %v3144_v53 = vmul.f32 -1.442695, %v4520_v17 }
 0x565   : > { %3313 = vpow2.f32 %v3138_v37  ;;  %v3145_v30 = vmul.f32 -1.442695, %v4525_v44 }
 0x566   : > { %3315 = vpow2.f32 %v3139_v19 }
 0x567   : > { %3317 = vpow2.f32 %v3140_v16 }
 0x568   : > { %3319 = vpow2.f32 %v3141_v20 }
 0x569   : > { %3321 = vpow2.f32 %v3142_v3 }
 0x56a   : > { %v3312_v14 = vpop.eup %3311  ;;  %3323 = vpow2.f32 %v3143_v34 }
 0x56b   : > { %v3314_v2 = vpop.eup %3313  ;;  %3325 = vpow2.f32 %v3144_v53  ;;  %v4532_v6 = vadd.f32 1.0, %v3312_v14  ;;  %v3348_v53 = vld [vmem:[%s3649_s23 + $0x8] sm:$0xff] }
 0x56c   : > { %v3316_v41 = vpop.eup %3315  ;;  %3327 = vpow2.f32 %v3145_v30  ;;  %v4534_v56 = vadd.f32 1.0, %v3314_v2  ;;  %v3350_v2 = vld [vmem:[%s3649_s23 + $0x18] sm:$0xff] }
 0x56d   : > { %v3318_v29 = vpop.eup %3317  ;;  %v4536_v50 = vadd.f32 1.0, %v3316_v41  ;;  %3329 = vrcp.f32 %v4532_v6  ;;  %v2616_v55 = vand.u32 2147483648, %v4532_v6  ;;  %vm2610_vm6 = vweird.f32 %v4532_v6 }
 0x56e   : > { %v3320_v52 = vpop.eup %3319  ;;  %v4539_v24 = vadd.f32 1.0, %v3318_v29  ;;  %3331 = vrcp.f32 %v4534_v56  ;;  %v2631_v45 = vand.u32 2147483648, %v4534_v56  ;;  %v2614_v49 = vand.u32 2147483647, %v4532_v6  ;;  %v3351_v29 = vld [vmem:[%s3649_s23 + $0x20] sm:$0xff] }
 0x56f   : > { %v3322_v39 = vpop.eup %3321  ;;  %v4542_v54 = vadd.f32 1.0, %v3320_v52  ;;  %3333 = vrcp.f32 %v4536_v50  ;;  %v2629_v40 = vand.u32 2147483647, %v4534_v56  ;;  %v4562_v25 = vor.u32 1.1754944e-38, %v2616_v55 }
 0x570   : > { %v3324_v36 = vpop.eup %3323  ;;  %3335 = vrcp.f32 %v4539_v24  ;;  %v4550_v15 = vadd.f32 1.0, %v3322_v39  ;;  %v4566_v23 = vor.u32 1.1754944e-38, %v2631_v45  ;;  %vm2625_vm9 = vweird.f32 %v4534_v56 }
 0x571   : > { %v3326_v18 = vpop.eup %3325  ;;  %3337 = vrcp.f32 %v4542_v54  ;;  %v4560_v21 = vadd.f32 1.0, %v3324_v36  ;;  %v2644_v42 = vand.u32 2147483647, %v4536_v50  ;;  %v2646_v62 = vand.u32 2147483648, %v4536_v50 }
 0x572   : > { %v3328_v33 = vpop.eup %3327  ;;  %v4570_v38 = vadd.f32 1.0, %v3326_v18  ;;  %vm2640_vm2 = vweird.f32 %v4536_v50  ;;  %3339 = vrcp.f32 %v4550_v15  ;;  %vm4585_vm15 = vcmp.eq.f32.partialorder %v2614_v49, 8.507059e+37 }
 0x573   : > { %v4548_v22 = vpop.eup %3329  ;;  %v4575_v7 = vadd.f32 1.0, %v3328_v33  ;;  %vm2655_vm8 = vweird.f32 %v4539_v24  ;;  %v2659_v28 = vand.u32 2147483647, %v4539_v24  ;;  %v2661_v32 = vand.u32 2147483648, %v4539_v24 }
 0x574   : > { %v4552_v10 = vpop.eup %3331  ;;  %v2606_v27 = vmul.f32 %v4548_v22, %v4532_v6  ;;  %vm2611_vm14 = vweird.f32 %v4548_v22  ;;  %v2674_v4 = vand.u32 2147483647, %v4542_v54  ;;  %vm4598_vm10 = vcmp.eq.f32.partialorder %v2629_v40, 8.507059e+37 }
 0x575   : > { %v2621_v59 = vmul.f32 %v4552_v10, %v4534_v56  ;;  %v4568_v0 = vpop.eup %3333  ;;  %vm2626_vm1 = vweird.f32 %v4552_v10  ;;  %v2647_v61 = vor.u32 1.1754944e-38, %v2646_v62  ;;  %3341 = vrcp.f32 %v4560_v21  ;;  %vm4621_vm12 = vmor %vm2610_vm6, %vm2611_vm14 }
 0x576   : > { %v2607_v31 = vsub.f32 1.0, %v2606_v27  ;;  %v2636_v8 = vmul.f32 %v4568_v0, %v4536_v50  ;;  %v4581_v46 = vpop.eup %3335  ;;  %v2676_v20 = vand.u32 2147483648, %v4542_v54  ;;  %vm2641_vm3 = vweird.f32 %v4568_v0  ;;  %vm4641_vm5 = vmor %vm2625_vm9, %vm2626_vm1 }
 0x577   : > { %v2622_v1 = vsub.f32 1.0, %v2621_v59  ;;  %v2651_v58 = vmul.f32 %v4581_v46, %v4539_v24  ;;  %v3338_v63 = vpop.eup %3337  ;;  %vm4608_vm0 = vcmp.eq.f32.partialorder %v2644_v42, 8.507059e+37  ;;  %vm4612_vm11 = vcmp.eq.f32.partialorder %v2659_v28, 8.507059e+37  ;;  %vm4655_vm9 = vmor %vm2640_vm2, %vm2641_vm3 }
 0x578   : > { %v2608_v47 = vmul.f32 %v4548_v22, %v2607_v31  ;;  %v2637_v51 = vsub.f32 1.0, %v2636_v8  ;;  %v2666_v16 = vmul.f32 %v3338_v63, %v4542_v54  ;;  %v2662_v30 = vor.u32 1.1754944e-38, %v2661_v32  ;;  %v3340_v14 = vpop.eup %3339 }
 0x579   : > { %v2623_v48 = vmul.f32 %v4552_v10, %v2622_v1  ;;  %v2652_v19 = vsub.f32 1.0, %v2651_v58  ;;  %vm2670_vm13 = vweird.f32 %v4542_v54  ;;  %vm2656_vm4 = vweird.f32 %v4581_v46 }
 0x57a   : > { %v2609_v26 = vadd.f32 %v4548_v22, %v2608_v47  ;;  %v2638_v37 = vmul.f32 %v4568_v0, %v2637_v51  ;;  %vm4627_vm7 = vcmp.eq.f32.partialorder %v2674_v4, 8.507059e+37  ;;  %v2691_v52 = vand.u32 2147483648, %v4550_v15  ;;  %vm4666_vm1 = vmor %vm2655_vm8, %vm2656_vm4 }
 0x57b   : > { %v2624_v3 = vadd.f32 %v4552_v10, %v2623_v48  ;;  %v2653_v41 = vmul.f32 %v4581_v46, %v2652_v19  ;;  %v2667_v36 = vsub.f32 1.0, %v2666_v16  ;;  %v2681_v18 = vmul.f32 %v3340_v14, %v4550_v15  ;;  %v3342_v27 = vpop.eup %3341 }
 0x57c   : > { %v2613_v39 = vsel %vm4621_vm12, %v4548_v22, %v2609_v26  ;;  %v2639_v6 = vadd.f32 %v4568_v0, %v2638_v37  ;;  %v2677_v33 = vor.u32 1.1754944e-38, %v2676_v20  ;;  %vm2685_vm6 = vweird.f32 %v4550_v15 }
 0x57d   : > { %v2654_v45 = vadd.f32 %v4581_v46, %v2653_v41  ;;  %v2689_v22 = vand.u32 2147483647, %v4550_v15  ;;  %v2628_v49 = vsel %vm4641_vm5, %v4552_v10, %v2624_v3  ;;  %v2668_v40 = vmul.f32 %v3338_v63, %v2667_v36 }
 0x57e   : > { %vm2671_vm14 = vweird.f32 %v3338_v63  ;;  %v2682_v59 = vsub.f32 1.0, %v2681_v18  ;;  %v2618_v31 = vsel %vm4585_vm15, %v4562_v25, %v2613_v39  ;;  %vm2686_vm12 = vweird.f32 %v3340_v14  ;;  %v3352_v39 = vld [vmem:[%s3649_s23 + $0x28] sm:$0xff]  ;;  %v3353_v18 = vld [vmem:[%s3649_s23 + $0x30] sm:$0xff] }
 0x57f   : > { %v2692_v50 = vor.u32 1.1754944e-38, %v2691_v52  ;;  %v2696_v42 = vmul.f32 %v3342_v27, %v4560_v21  ;;  %v2643_v62 = vsel %vm4655_vm9, %v4568_v0, %v2639_v6  ;;  %v2658_v25 = vsel %vm4666_vm1, %v4581_v46, %v2654_v45  ;;  %vm2672_vm2 = vmor %vm2670_vm13, %vm2671_vm14 }
 0x580   : > { %v2669_v1 = vadd.f32 %v3338_v63, %v2668_v40  ;;  %v2683_v8 = vmul.f32 %v3340_v14, %v2682_v59  ;;  %v2633_v24 = vsel %vm4598_vm10, %v4566_v23, %v2628_v49  ;;  %v2704_v60 = vand.u32 2147483647, %v4560_v21  ;;  %vm2687_vm15 = vmor %vm2685_vm6, %vm2686_vm12 }
 0x581   : > { %v2697_v47 = vsub.f32 1.0, %v2696_v42  ;;  %3343 = vrcp.f32 %v4570_v38  ;;  %v2706_v32 = vand.u32 2147483648, %v4560_v21  ;;  %v2648_v46 = vsel %vm4608_vm0, %v2647_v61, %v2643_v62 }
 0x582   : > { %v2673_v28 = vsel %vm2672_vm2, %v3338_v63, %v2669_v1  ;;  %v2684_v0 = vadd.f32 %v3340_v14, %v2683_v8  ;;  %3345 = vrcp.f32 %v4575_v7  ;;  %v2663_v23 = vsel %vm4612_vm11, %v2662_v30, %v2658_v25  ;;  %v3354_v25 = vld [vmem:[%s3649_s23 + $0x38] sm:$0xff]  ;;  %v3355_v8 = vld [vmem:[%s3649_s23 + $0x40] sm:$0xff] }
 0x583   : > { %v2698_v54 = vmul.f32 %v3342_v27, %v2697_v47  ;;  %vm2701_vm8 = vweird.f32 %v3342_v27  ;;  %v2678_v48 = vsel %vm4627_vm7, %v2677_v33, %v2673_v28  ;;  %vm2690_vm10 = vcmp.eq.f32.partialorder %v2689_v22, 8.507059e+37 }
 0x584   : > { %v2688_v51 = vsel %vm2687_vm15, %v3340_v14, %v2684_v0  ;;  %vm2700_vm3 = vweird.f32 %v4560_v21  ;;  %v2740_v63 = vmul.f32 %v2618_v31, %v4505_v9  ;;  %v2741_v26 = vmul.f32 %v2633_v24, %v4507_v57  ;;  %v3347_v9 = vld [vmem:[%s3649_s23] sm:$0xff]  ;;  %v3349_v14 = vld [vmem:[%s3649_s23 + $0x10] sm:$0xff] }
 0x585   : > { %v2693_v58 = vsel %vm2690_vm10, %v2692_v50, %v2688_v51  ;;  %v2699_v4 = vadd.f32 %v3342_v27, %v2698_v54  ;;  %vm2702_vm0 = vmor %vm2700_vm3, %vm2701_vm8  ;;  %vm2705_vm11 = vcmp.eq.f32.partialorder %v2704_v60, 8.507059e+37  ;;  %v2707_v15 = vor.u32 1.1754944e-38, %v2706_v32 }
 0x586   : > { %v2742_v5 = vmul.f32 %v2648_v46, %v4509_v35  ;;  %v2743_v61 = vmul.f32 %v2663_v23, %v4511_v13  ;;  %v2744_v21 = vmul.f32 %v2678_v48, %v4513_v12  ;;  %v2745_v16 = vmul.f32 %v2693_v58, %v4515_v11 }
 0x587   : > { %v3344_v37 = vpop.eup %3343  ;;  %v2703_v19 = vsel %vm2702_vm0, %v3342_v27, %v2699_v4  ;;  %v2749_v20 = vadd.f32 %v3347_v9, %v2740_v63  ;;  %v2750_v35 = vadd.f32 %v3348_v53, %v2741_v26  ;;  %v2719_v33 = vand.u32 2147483647, %v4570_v38 }
 0x588   : > { %v3346_v57 = vpop.eup %3345  ;;  %v2708_v3 = vsel %vm2705_vm11, %v2707_v15, %v2703_v19  ;;  %v2711_v34 = vmul.f32 %v3344_v37, %v4570_v38  ;;  %v2751_v12 = vadd.f32 %v3349_v14, %v2742_v5  ;;  %v2752_v41 = vadd.f32 %v3350_v2, %v2743_v61 }
 0x589   : > { %v2726_v13 = vmul.f32 %v3346_v57, %v4575_v7  ;;  %v2746_v30 = vmul.f32 %v2708_v3, %v4517_v43  ;;  %2758 = vst [vmem:[%s4710_s25] sm:$0xff] %v2749_v20  ;;  %v2753_v52 = vadd.f32 %v3351_v29, %v2744_v21  ;;  %v2754_v6 = vadd.f32 %v3352_v39, %v2745_v16 }
 0x58a   : > { %v2712_v11 = vsub.f32 1.0, %v2711_v34  ;;  %2759 = vst [vmem:[%s4710_s25 + $0x8] sm:$0xff] %v2750_v35  ;;  %v2721_v43 = vand.u32 2147483648, %v4570_v38  ;;  %vm2716_vm13 = vweird.f32 %v3344_v37  ;;  %v2736_v22 = vand.u32 2147483648, %v4575_v7 }
 0x58b   : > { %v2727_v36 = vsub.f32 1.0, %v2726_v13  ;;  %v2755_v55 = vadd.f32 %v3353_v18, %v2746_v30  ;;  %2760 = vst [vmem:[%s4710_s25 + $0x10] sm:$0xff] %v2751_v12  ;;  %vm2731_vm4 = vweird.f32 %v3346_v57  ;;  %v2734_v49 = vand.u32 2147483647, %v4575_v7 }
 0x58c   : > { %v2713_v45 = vmul.f32 %v3344_v37, %v2712_v11  ;;  %2761 = vst [vmem:[%s4710_s25 + $0x18] sm:$0xff] %v2752_v41  ;;  %vm2715_vm7 = vweird.f32 %v4570_v38  ;;  %v2722_v40 = vor.u32 1.1754944e-38, %v2721_v43  ;;  %vm2730_vm6 = vweird.f32 %v4575_v7 }
 0x58d   : > { %v2728_v27 = vmul.f32 %v3346_v57, %v2727_v36  ;;  %2762 = vst [vmem:[%s4710_s25 + $0x20] sm:$0xff] %v2753_v52  ;;  %vm2717_vm5 = vmor %vm2715_vm7, %vm2716_vm13  ;;  %vm2720_vm9 = vcmp.eq.f32.partialorder %v2719_v33, 8.507059e+37  ;;  %v2737_v10 = vor.u32 1.1754944e-38, %v2736_v22  ;;  %vm2735_vm1 = vcmp.eq.f32.partialorder %v2734_v49, 8.507059e+37 }
 0x58e   : > { %v2714_v56 = vadd.f32 %v3344_v37, %v2713_v45  ;;  %2763 = vst [vmem:[%s4710_s25 + $0x28] sm:$0xff] %v2754_v6  ;;  %vm2732_vm14 = vmor %vm2730_vm6, %vm2731_vm4 }
 0x58f   : > { %v2729_v59 = vadd.f32 %v3346_v57, %v2728_v27  ;;  %2764 = vst [vmem:[%s4710_s25 + $0x30] sm:$0xff] %v2755_v55 }
 0x590   : > { %v2718_v31 = vsel %vm2717_vm5, %v3344_v37, %v2714_v56 }
 0x591   : > { %v2723_v38 = vsel %vm2720_vm9, %v2722_v40, %v2718_v31  ;;  %v2733_v50 = vsel %vm2732_vm14, %v3346_v57, %v2729_v59 }
 0x592   : > { %v2738_v42 = vsel %vm2735_vm1, %v2737_v10, %v2733_v50  ;;  %v2747_v7 = vmul.f32 %v2723_v38, %v4520_v17 }
 0x593   : > { %v2748_v62 = vmul.f32 %v2738_v42, %v4525_v44 }
 0x594   : > { %v2756_v1 = vadd.f32 %v3354_v25, %v2747_v7 }
 0x595   : > { %v2757_v24 = vadd.f32 %v3355_v8, %v2748_v62 }
 0x596   : > { %2765 = vst [vmem:[%s4710_s25 + $0x38] sm:$0xff] %v2756_v1 }
 0x597   : > { %2766 = vst [vmem:[%s4710_s25 + $0x40] sm:$0xff] %v2757_v24 }
 0x598   : > { %3443 = shalt.err (!%p3440_p10)
}
 0x599   : > { %s3492_s19 = smov 128   ;;  %s3493_s23 = smov 8  }
 0x59a   : > { %3211 = dma.vmem_to_hbm [thread:$0]  (%p3614_p7), %s2781_s22, 1152, %s2783_s26, %s2768_s27, %s3492_s19, %s3492_s19, %s3493_s23  }
 0x59b PF: > { %s4941_s24 = sld [smem:[#allocation14_spill]]  ;;  %s2797_s25 = sand.u32 1, %s3474_s30  }
 0x59c   : > { %s2798_s11 = scalar_lea.sflag [#allocation6], %s2797_s25 }
 0x5a1   : > { %p4942_p12 = scmp.ge.s32.totalorder %s4941_s24, 2 }
 0x5a3   : > { %p3222_p13 = pnand %p4942_p12, %p3579_p6 }
 0x5a5   : > { %p3223_p0 = pneg %p3222_p13 }
 0x5a7   : > { %3469 = dma.done.wait (%p3223_p0), %s2798_s11, 1152  }
 0x5a8   : > { %3471 = vsyncadd (%p3223_p0), %s2798_s11, 4294966144  ;;  %s4943_s12 = sld [smem:[#allocation15_spill]]  ;;  %s4946_s30 = smov %s3478_s10 }
 0x5a9   : > { %s4944_s13 = sld [smem:[#allocation13_spill]] }
 0x5aa   : > { %s4945_s11 = sld [smem:[#allocation16_spill]] }
 0x5ae   : > { %p23_p3 = scmp.ge.s32.totalorder %s4943_s12, 4  }
 0x5af   : > { %s4947_s10 = smov %s4944_s13 }
 0x5b0   :  { %25 = sbr.rel (!%p23_p3) target bundleno = 8 (0x8), region = 113 }
 0x5b5   :  { %2804 = vsyncpa [#allocation5], 1 }
 0x5b6   :  { %2806 = vsyncpa [#allocation5 + $0x1], 1 }
 0x5b7   :  { %2807 = vsyncpa [#allocation8], 1 }
 0x5b8   :  { %2808 = vsyncpa [#allocation6], 1 }
 0x5b9   :  { %2810 = vsyncpa [#allocation6 + $0x1], 1 }

</bundles_post_ra>
